<compile_context>
chip_gen: v7x
topology: tpu7x:2x2x1
jax: 0.10.0
libtpu: 0.0.40
codegen_flags: <defaults>
</compile_context>

<pallas_src>
import functools

import jax
import jax.numpy as jnp
from jax.experimental import pallas as pl
from jax.experimental.pallas import tpu as pltpu


def _attention_kernel(x_ref, wqkv_ref, bqkv_ref, wproj_ref, bproj_ref, o_ref,
                      qkv_ref, s_ref, wa_ref, *, n_heads):
    """Fused attention for ONE batch sample.

    x_ref:     (T, D)      input tokens
    wqkv_ref:  (D, 3D)     qkv weight, transposed; q-columns pre-scaled
    bqkv_ref:  (1, 3D)     qkv bias; q-entries pre-scaled
    wproj_ref: (D, D)      output-projection weight, transposed
    bproj_ref: (1, D)      output-projection bias
    o_ref:     (T, D)      output tokens
    qkv_ref:   (T, 3D)     VMEM scratch: qkv activations
    s_ref:     (H, T, T)   VMEM scratch: per-head scores, overwritten with exp
    wa_ref:    (T, D)      VMEM scratch: concat_heads(attn @ v)
    """
    T, D = x_ref.shape
    H = n_heads
    Hd = D // H

    # ---- QKV projection (attention scale already folded into the weights) ---
    qkv_ref[...] = (jnp.dot(x_ref[...], wqkv_ref[...],
                            preferred_element_type=jnp.float32)
                    + bqkv_ref[...])

    # ---- pass 1: per-head raw scores -> s_ref[h]; running max over heads ----
    # (softmax is over the HEADS axis, dim=1 in the reference module)
    m = None
    for h in range(H):
        qh = qkv_ref[:, h * Hd:(h + 1) * Hd]                # (T, Hd)
        kh = qkv_ref[:, D + h * Hd:D + (h + 1) * Hd]        # (T, Hd)
        dp_h = jax.lax.dot_general(
            qh, kh, (((1,), (1,)), ((), ())),               # q @ k^T
            preferred_element_type=jnp.float32)             # (T, T)
        s_ref[h] = dp_h
        m = dp_h if m is None else jnp.maximum(m, dp_h)

    # ---- pass 2: exponentiate in place, accumulate heads-axis denominator ---
    denom = jnp.zeros((T, T), jnp.float32)
    for h in range(H):
        e_h = jnp.exp(s_ref[h] - m)
        s_ref[h] = e_h
        denom = denom + e_h
    inv = 1.0 / denom        # exact f32 divide (keeps the 1e-4 parity contract)

    # ---- pass 3: per-head weighted average into contiguous column slices ----
    for h in range(H):
        vh = qkv_ref[:, 2 * D + h * Hd:2 * D + (h + 1) * Hd]  # (T, Hd)
        attn_h = s_ref[h] * inv                               # (T, T)
        wa_ref[:, h * Hd:(h + 1) * Hd] = jnp.dot(
            attn_h, vh, preferred_element_type=jnp.float32)   # (T, Hd)

    # ---- output projection: ONE (T, D) @ (D, D) matmul ----------------------
    out = jnp.dot(wa_ref[...], wproj_ref[...],
                  preferred_element_type=jnp.float32) + bproj_ref[...]
    o_ref[...] = out.astype(o_ref.dtype)


def _ceil(a, b):
    return (a + b - 1) // b


def _padded_bytes(rows, cols, itemsize=4):
    """f32 VMEM footprint of a (rows, cols) slab after (8, 128) tiling."""
    return _ceil(rows, 8) * 8 * _ceil(cols, 128) * 128 * itemsize


def _pick_vmem_limit(T, D, H, single_buffer_weights):
    """Size vmem_limit_bytes from the actual working set, capped by the chip."""
    wbuf = 1 if single_buffer_weights else 2
    weights = wbuf * (_padded_bytes(D, 3 * D) + _padded_bytes(1, 3 * D)
                      + _padded_bytes(D, D) + _padded_bytes(1, D))
    io = 2 * 2 * _padded_bytes(T, D)              # x + out, double-buffered
    scratch = (H * _padded_bytes(T, T)            # per-head scores
               + _padded_bytes(T, 3 * D)          # qkv activations
               + _padded_bytes(T, D))             # concat(weighted) slab
    need = weights + io + scratch
    want = int(need * 1.5) + (4 << 20)            # headroom for compiler temps
    try:
        info = pltpu.get_tpu_info()
        phys = int(getattr(info, "vmem_capacity_bytes", 0)) or (64 << 20)
    except Exception:
        phys = 64 << 20                           # conservative default (v7x)
    cap = int(phys * 0.9)
    return max(16 << 20, min(want, cap))


def attention_forward(x, w_qkv, b_qkv, w_proj, b_proj, *, n_heads,
                      single_buffer_weights=True):
    """Attention.forward.

    Args:
        x:      (B, T, D)   tokens (n_samples, n_patches + 1, dim)
        w_qkv:  (3*D, D)    nn.Linear(dim, 3*dim) weight (PyTorch layout)
        b_qkv:  (3*D,)      its bias
        w_proj: (D, D)      nn.Linear(dim, dim) weight
        b_proj: (D,)        its bias

    Returns:
        (B, T, D)
    """
    B, T, D = x.shape
    if D % n_heads != 0:
        raise ValueError("dim must be divisible by n_heads")
    H = n_heads
    Hd = D // H
    scale = float(Hd) ** -0.5
    f32 = jnp.float32

    # PyTorch Linear computes x @ W.T + b; pre-transpose once in the wrapper.
    wqkv_t = jnp.transpose(w_qkv).astype(f32)     # (D, 3D)
    wproj_t = jnp.transpose(w_proj).astype(f32)   # (D, D)
    bqkv2 = b_qkv.reshape(1, 3 * D).astype(f32)
    bproj2 = b_proj.reshape(1, D).astype(f32)

    # Fold the attention scale into the q-producing columns (first D columns of
    # wqkv_t, first D entries of bqkv): (x @ (s*Wq) + s*bq) @ k^T == s*(q @ k^T)
    q_scale = jnp.concatenate(
        [jnp.full((1, D), scale, f32), jnp.ones((1, 2 * D), f32)], axis=1)
    wqkv_t = wqkv_t * q_scale
    bqkv2 = bqkv2 * q_scale

    def const_spec(arr):
        """Weight/bias spec: constant index_map; single-buffered if requested."""
        shape = arr.shape
        index_map = lambda b, _s=shape: (0,) * len(_s)
        if single_buffer_weights:
            return pl.BlockSpec(shape, index_map,
                                pipeline_mode=pl.Buffered(buffer_count=1))
        return pl.BlockSpec(shape, index_map)

    kernel = functools.partial(_attention_kernel, n_heads=H)

    flops = (2 * B * T * D * 3 * D          # qkv projection
             + 4 * B * H * T * T * Hd       # scores + attn @ v
             + 2 * B * T * D * D)           # output projection
    cost = pl.CostEstimate(
        flops=flops,
        transcendentals=B * H * T * T,      # exp in softmax
        bytes_accessed=4 * (x.size + wqkv_t.size + bqkv2.size
                            + wproj_t.size + bproj2.size + B * T * D))

    return pl.pallas_call(
        kernel,
        out_shape=jax.ShapeDtypeStruct((B, T, D), x.dtype),
        grid_spec=pltpu.PrefetchScalarGridSpec(
            num_scalar_prefetch=0,
            grid=(B,),                                            # one sample / step
            in_specs=[
                pl.BlockSpec((None, T, D), lambda b: (b, 0, 0)),  # x sample
                const_spec(wqkv_t),                               # Wqkv (resident)
                const_spec(bqkv2),                                # bqkv
                const_spec(wproj_t),                              # Wproj (resident)
                const_spec(bproj2),                               # bproj
            ],
            out_specs=pl.BlockSpec((None, T, D), lambda b: (b, 0, 0)),
            scratch_shapes=[
                pltpu.VMEM((T, 3 * D), jnp.float32),   # qkv activations
                pltpu.VMEM((H, T, T), jnp.float32),    # per-head scores / exp
                pltpu.VMEM((T, D), jnp.float32),       # concat(weighted) slab
            ],
        ),
        compiler_params=pltpu.CompilerParams(
            dimension_semantics=("parallel",),        # megacore over batch
            vmem_limit_bytes=_pick_vmem_limit(T, D, H, single_buffer_weights),
        ),
        cost_estimate=cost,
    )(x, wqkv_t, bqkv2, wproj_t, bproj2)


if __name__ == "__main__":
    # Small shapes consistent with the module: batch=2, seq(tokens)=8, dim=32,
    # n_heads=4 (dim must be divisible by n_heads).
    batch, seq, dim, n_heads = 2, 8, 32, 4
    head_dim = dim // n_heads

    key = jax.random.PRNGKey(0)
    kx, k1, k2, k3, k4 = jax.random.split(key, 5)

    x = jax.random.normal(kx, (batch, seq, dim), dtype=jnp.float32)
    w_qkv = jax.random.normal(k1, (3 * dim, dim), jnp.float32) * (dim ** -0.5)
    b_qkv = jax.random.normal(k2, (3 * dim,), jnp.float32) * 0.02
    w_proj = jax.random.normal(k3, (dim, dim), jnp.float32) * (dim ** -0.5)
    b_proj = jax.random.normal(k4, (dim,), jnp.float32) * 0.02

    fwd = jax.jit(functools.partial(attention_forward, n_heads=n_heads))
    try:
        out = jax.block_until_ready(fwd(x, w_qkv, b_qkv, w_proj, b_proj))
    except Exception:
        # Robustness fallback: if single-buffered weight specs (pl.Buffered(1))
        # are not supported by this JAX build, retry with standard specs.
        fwd = jax.jit(functools.partial(attention_forward, n_heads=n_heads,
                                        single_buffer_weights=False))
        out = jax.block_until_ready(fwd(x, w_qkv, b_qkv, w_proj, b_proj))

    # ---- pure-JAX reference replicating the PyTorch forward exactly ----------
    # (including softmax over dim=1, the heads axis, as written in the module)
    with jax.default_matmul_precision("float32"):
        scale = head_dim ** -0.5
        qkv = x @ w_qkv.T + b_qkv
        qkv = qkv.reshape(batch, seq, 3, n_heads, head_dim)
        qkv = jnp.transpose(qkv, (2, 0, 3, 1, 4))          # (3, B, H, T, Hd)
        q, k, v = qkv[0], qkv[1], qkv[2]
        dp = jnp.einsum("bhtd,bhsd->bhts", q, k) * scale   # (B, H, T, T)
        attn = jax.nn.softmax(dp, axis=1)                  # softmax over heads
        wa = jnp.einsum("bhts,bhsd->bhtd", attn, v)        # (B, H, T, Hd)
        wa = jnp.transpose(wa, (0, 2, 1, 3)).reshape(batch, seq, dim)
        ref = wa @ w_proj.T + b_proj

    assert out.shape == (batch, seq, dim), out.shape
    max_err = float(jnp.max(jnp.abs(out - ref)))
    assert jnp.allclose(out, ref, atol=1e-4, rtol=1e-4), max_err

    print("KERNEL_OK")
</pallas_src>

<mosaic_0001>
module attributes {stable_mosaic.version = 11 : i64} {
  func.func @_attention_kernel(%arg0: i32, %arg1: memref<1x8x32xf32, #tpu.memory_space<vmem>>, %arg2: memref<32x96xf32, #tpu.memory_space<vmem>>, %arg3: memref<1x96xf32, #tpu.memory_space<vmem>>, %arg4: memref<32x32xf32, #tpu.memory_space<vmem>>, %arg5: memref<1x32xf32, #tpu.memory_space<vmem>>, %arg6: memref<1x8x32xf32, #tpu.memory_space<vmem>>, %arg7: memref<8x96xf32, #tpu.memory_space<vmem>>, %arg8: memref<4x8x8xf32, #tpu.memory_space<vmem>>, %arg9: memref<8x32xf32, #tpu.memory_space<vmem>>) attributes {dimension_semantics = [#tpu.dimension_semantics<parallel>], iteration_bounds = array<i64: 2>, scalar_prefetch = 0 : i64, scratch_operands = 3 : i64, tpu.core_type = #tpu.core_type<tc>, window_params = [{transform_indices = @transform_0, window_bounds = array<i64: 1, 8, 32>}, {pipeline_mode = #tpu.pipeline_mode<synchronous>, transform_indices = @transform_1, window_bounds = array<i64: 32, 96>}, {pipeline_mode = #tpu.pipeline_mode<synchronous>, transform_indices = @transform_2, window_bounds = array<i64: 1, 96>}, {pipeline_mode = #tpu.pipeline_mode<synchronous>, transform_indices = @transform_3, window_bounds = array<i64: 32, 32>}, {pipeline_mode = #tpu.pipeline_mode<synchronous>, transform_indices = @transform_4, window_bounds = array<i64: 1, 32>}, {transform_indices = @transform_5, window_bounds = array<i64: 1, 8, 32>}]} {
    %c0 = arith.constant 0 : index
    %c0_0 = arith.constant 0 : index
    %c0_1 = arith.constant 0 : index
    %0 = vector.load %arg1[%c0, %c0_0, %c0_1] : memref<1x8x32xf32, #tpu.memory_space<vmem>>, vector<1x8x32xf32>
    %1 = vector.shape_cast %0 : vector<1x8x32xf32> to vector<8x32xf32>
    %c0_2 = arith.constant 0 : index
    %c0_3 = arith.constant 0 : index
    %2 = vector.load %arg2[%c0_2, %c0_3] : memref<32x96xf32, #tpu.memory_space<vmem>>, vector<32x96xf32>
    %cst = arith.constant dense<0.000000e+00> : vector<8x96xf32>
    %3 = tpu.matmul %1, %2, %cst {dimension_numbers = #tpu.dot_dimension_numbers<[1], [0], [0], [1], [0, 0, 1, 1], [], []>} : vector<8x32xf32>, vector<32x96xf32>, vector<8x96xf32> -> vector<8x96xf32>
    %c0_4 = arith.constant 0 : index
    %c0_5 = arith.constant 0 : index
    %4 = vector.load %arg3[%c0_4, %c0_5] : memref<1x96xf32, #tpu.memory_space<vmem>>, vector<1x96xf32>
    %5 = vector.broadcast %4 : vector<1x96xf32> to vector<8x96xf32>
    %6 = arith.addf %3, %5 : vector<8x96xf32>
    %c0_6 = arith.constant 0 : index
    %c0_7 = arith.constant 0 : index
    %7 = vector.load %arg7[%c0_6, %c0_7] : memref<8x96xf32, #tpu.memory_space<vmem>>, vector<8x96xf32>
    tpu.vector_store %arg7[%c0_6, %c0_7], %6 {strides = array<i32>} : memref<8x96xf32, #tpu.memory_space<vmem>>, vector<8x96xf32>,
    %c0_8 = arith.constant 0 : index
    %c0_9 = arith.constant 0 : index
    %8 = vector.load %arg7[%c0_8, %c0_9] : memref<8x96xf32, #tpu.memory_space<vmem>>, vector<8x8xf32>
    %c0_10 = arith.constant 0 : index
    %c32 = arith.constant 32 : index
    %9 = vector.load %arg7[%c0_10, %c32] : memref<8x96xf32, #tpu.memory_space<vmem>>, vector<8x8xf32>
    %cst_11 = arith.constant dense<0.000000e+00> : vector<8x8xf32>
    %10 = tpu.matmul %8, %9, %cst_11 {dimension_numbers = #tpu.dot_dimension_numbers<[1], [1], [0], [0], [0, 0, 1, 0], [], []>} : vector<8x8xf32>, vector<8x8xf32>, vector<8x8xf32> -> vector<8x8xf32>
    %c0_12 = arith.constant 0 : index
    %c0_13 = arith.constant 0 : index
    %c0_14 = arith.constant 0 : index
    %11 = vector.load %arg8[%c0_12, %c0_13, %c0_14] : memref<4x8x8xf32, #tpu.memory_space<vmem>>, vector<1x8x8xf32>
    %12 = vector.shape_cast %11 : vector<1x8x8xf32> to vector<8x8xf32>
    %13 = vector.shape_cast %10 : vector<8x8xf32> to vector<1x8x8xf32>
    tpu.vector_store %arg8[%c0_12, %c0_13, %c0_14], %13 {strides = array<i32>} : memref<4x8x8xf32, #tpu.memory_space<vmem>>, vector<1x8x8xf32>,
    %c0_15 = arith.constant 0 : index
    %c8 = arith.constant 8 : index
    %14 = vector.load %arg7[%c0_15, %c8] : memref<8x96xf32, #tpu.memory_space<vmem>>, vector<8x8xf32>
    %c0_16 = arith.constant 0 : index
    %c40 = arith.constant 40 : index
    %15 = vector.load %arg7[%c0_16, %c40] : memref<8x96xf32, #tpu.memory_space<vmem>>, vector<8x8xf32>
    %cst_17 = arith.constant dense<0.000000e+00> : vector<8x8xf32>
    %16 = tpu.matmul %14, %15, %cst_17 {dimension_numbers = #tpu.dot_dimension_numbers<[1], [1], [0], [0], [0, 0, 1, 0], [], []>} : vector<8x8xf32>, vector<8x8xf32>, vector<8x8xf32> -> vector<8x8xf32>
    %c1 = arith.constant 1 : index
    %c0_18 = arith.constant 0 : index
    %c0_19 = arith.constant 0 : index
    %17 = vector.load %arg8[%c1, %c0_18, %c0_19] : memref<4x8x8xf32, #tpu.memory_space<vmem>>, vector<1x8x8xf32>
    %18 = vector.shape_cast %17 : vector<1x8x8xf32> to vector<8x8xf32>
    %19 = vector.shape_cast %16 : vector<8x8xf32> to vector<1x8x8xf32>
    tpu.vector_store %arg8[%c1, %c0_18, %c0_19], %19 {strides = array<i32>} : memref<4x8x8xf32, #tpu.memory_space<vmem>>, vector<1x8x8xf32>,
    %20 = arith.maximumf %10, %16 : vector<8x8xf32>
    %c0_20 = arith.constant 0 : index
    %c16 = arith.constant 16 : index
    %21 = vector.load %arg7[%c0_20, %c16] : memref<8x96xf32, #tpu.memory_space<vmem>>, vector<8x8xf32>
    %c0_21 = arith.constant 0 : index
    %c48 = arith.constant 48 : index
    %22 = vector.load %arg7[%c0_21, %c48] : memref<8x96xf32, #tpu.memory_space<vmem>>, vector<8x8xf32>
    %cst_22 = arith.constant dense<0.000000e+00> : vector<8x8xf32>
    %23 = tpu.matmul %21, %22, %cst_22 {dimension_numbers = #tpu.dot_dimension_numbers<[1], [1], [0], [0], [0, 0, 1, 0], [], []>} : vector<8x8xf32>, vector<8x8xf32>, vector<8x8xf32> -> vector<8x8xf32>
    %c2 = arith.constant 2 : index
    %c0_23 = arith.constant 0 : index
    %c0_24 = arith.constant 0 : index
    %24 = vector.load %arg8[%c2, %c0_23, %c0_24] : memref<4x8x8xf32, #tpu.memory_space<vmem>>, vector<1x8x8xf32>
    %25 = vector.shape_cast %24 : vector<1x8x8xf32> to vector<8x8xf32>
    %26 = vector.shape_cast %23 : vector<8x8xf32> to vector<1x8x8xf32>
    tpu.vector_store %arg8[%c2, %c0_23, %c0_24], %26 {strides = array<i32>} : memref<4x8x8xf32, #tpu.memory_space<vmem>>, vector<1x8x8xf32>,
    %27 = arith.maximumf %20, %23 : vector<8x8xf32>
    %c0_25 = arith.constant 0 : index
    %c24 = arith.constant 24 : index
    %28 = vector.load %arg7[%c0_25, %c24] : memref<8x96xf32, #tpu.memory_space<vmem>>, vector<8x8xf32>
    %c0_26 = arith.constant 0 : index
    %c56 = arith.constant 56 : index
    %29 = vector.load %arg7[%c0_26, %c56] : memref<8x96xf32, #tpu.memory_space<vmem>>, vector<8x8xf32>
    %cst_27 = arith.constant dense<0.000000e+00> : vector<8x8xf32>
    %30 = tpu.matmul %28, %29, %cst_27 {dimension_numbers = #tpu.dot_dimension_numbers<[1], [1], [0], [0], [0, 0, 1, 0], [], []>} : vector<8x8xf32>, vector<8x8xf32>, vector<8x8xf32> -> vector<8x8xf32>
    %c3 = arith.constant 3 : index
    %c0_28 = arith.constant 0 : index
    %c0_29 = arith.constant 0 : index
    %31 = vector.load %arg8[%c3, %c0_28, %c0_29] : memref<4x8x8xf32, #tpu.memory_space<vmem>>, vector<1x8x8xf32>
    %32 = vector.shape_cast %31 : vector<1x8x8xf32> to vector<8x8xf32>
    %33 = vector.shape_cast %30 : vector<8x8xf32> to vector<1x8x8xf32>
    tpu.vector_store %arg8[%c3, %c0_28, %c0_29], %33 {strides = array<i32>} : memref<4x8x8xf32, #tpu.memory_space<vmem>>, vector<1x8x8xf32>,
    %34 = arith.maximumf %27, %30 : vector<8x8xf32>
    %cst_30 = arith.constant 0.000000e+00 : f32
    %35 = vector.broadcast %cst_30 : f32 to vector<8x8xf32>
    %c0_31 = arith.constant 0 : index
    %c0_32 = arith.constant 0 : index
    %c0_33 = arith.constant 0 : index
    %36 = vector.load %arg8[%c0_31, %c0_32, %c0_33] : memref<4x8x8xf32, #tpu.memory_space<vmem>>, vector<1x8x8xf32>
    %37 = vector.shape_cast %36 : vector<1x8x8xf32> to vector<8x8xf32>
    %38 = arith.subf %37, %34 : vector<8x8xf32>
    %39 = math.exp %38 : vector<8x8xf32>
    %c0_34 = arith.constant 0 : index
    %c0_35 = arith.constant 0 : index
    %c0_36 = arith.constant 0 : index
    %40 = vector.load %arg8[%c0_34, %c0_35, %c0_36] : memref<4x8x8xf32, #tpu.memory_space<vmem>>, vector<1x8x8xf32>
    %41 = vector.shape_cast %40 : vector<1x8x8xf32> to vector<8x8xf32>
    %42 = vector.shape_cast %39 : vector<8x8xf32> to vector<1x8x8xf32>
    tpu.vector_store %arg8[%c0_34, %c0_35, %c0_36], %42 {strides = array<i32>} : memref<4x8x8xf32, #tpu.memory_space<vmem>>, vector<1x8x8xf32>,
    %43 = arith.addf %35, %39 : vector<8x8xf32>
    %c1_37 = arith.constant 1 : index
    %c0_38 = arith.constant 0 : index
    %c0_39 = arith.constant 0 : index
    %44 = vector.load %arg8[%c1_37, %c0_38, %c0_39] : memref<4x8x8xf32, #tpu.memory_space<vmem>>, vector<1x8x8xf32>
    %45 = vector.shape_cast %44 : vector<1x8x8xf32> to vector<8x8xf32>
    %46 = arith.subf %45, %34 : vector<8x8xf32>
    %47 = math.exp %46 : vector<8x8xf32>
    %c1_40 = arith.constant 1 : index
    %c0_41 = arith.constant 0 : index
    %c0_42 = arith.constant 0 : index
    %48 = vector.load %arg8[%c1_40, %c0_41, %c0_42] : memref<4x8x8xf32, #tpu.memory_space<vmem>>, vector<1x8x8xf32>
    %49 = vector.shape_cast %48 : vector<1x8x8xf32> to vector<8x8xf32>
    %50 = vector.shape_cast %47 : vector<8x8xf32> to vector<1x8x8xf32>
    tpu.vector_store %arg8[%c1_40, %c0_41, %c0_42], %50 {strides = array<i32>} : memref<4x8x8xf32, #tpu.memory_space<vmem>>, vector<1x8x8xf32>,
    %51 = arith.addf %43, %47 : vector<8x8xf32>
    %c2_43 = arith.constant 2 : index
    %c0_44 = arith.constant 0 : index
    %c0_45 = arith.constant 0 : index
    %52 = vector.load %arg8[%c2_43, %c0_44, %c0_45] : memref<4x8x8xf32, #tpu.memory_space<vmem>>, vector<1x8x8xf32>
    %53 = vector.shape_cast %52 : vector<1x8x8xf32> to vector<8x8xf32>
    %54 = arith.subf %53, %34 : vector<8x8xf32>
    %55 = math.exp %54 : vector<8x8xf32>
    %c2_46 = arith.constant 2 : index
    %c0_47 = arith.constant 0 : index
    %c0_48 = arith.constant 0 : index
    %56 = vector.load %arg8[%c2_46, %c0_47, %c0_48] : memref<4x8x8xf32, #tpu.memory_space<vmem>>, vector<1x8x8xf32>
    %57 = vector.shape_cast %56 : vector<1x8x8xf32> to vector<8x8xf32>
    %58 = vector.shape_cast %55 : vector<8x8xf32> to vector<1x8x8xf32>
    tpu.vector_store %arg8[%c2_46, %c0_47, %c0_48], %58 {strides = array<i32>} : memref<4x8x8xf32, #tpu.memory_space<vmem>>, vector<1x8x8xf32>,
    %59 = arith.addf %51, %55 : vector<8x8xf32>
    %c3_49 = arith.constant 3 : index
    %c0_50 = arith.constant 0 : index
    %c0_51 = arith.constant 0 : index
    %60 = vector.load %arg8[%c3_49, %c0_50, %c0_51] : memref<4x8x8xf32, #tpu.memory_space<vmem>>, vector<1x8x8xf32>
    %61 = vector.shape_cast %60 : vector<1x8x8xf32> to vector<8x8xf32>
    %62 = arith.subf %61, %34 : vector<8x8xf32>
    %63 = math.exp %62 : vector<8x8xf32>
    %c3_52 = arith.constant 3 : index
    %c0_53 = arith.constant 0 : index
    %c0_54 = arith.constant 0 : index
    %64 = vector.load %arg8[%c3_52, %c0_53, %c0_54] : memref<4x8x8xf32, #tpu.memory_space<vmem>>, vector<1x8x8xf32>
    %65 = vector.shape_cast %64 : vector<1x8x8xf32> to vector<8x8xf32>
    %66 = vector.shape_cast %63 : vector<8x8xf32> to vector<1x8x8xf32>
    tpu.vector_store %arg8[%c3_52, %c0_53, %c0_54], %66 {strides = array<i32>} : memref<4x8x8xf32, #tpu.memory_space<vmem>>, vector<1x8x8xf32>,
    %67 = arith.addf %59, %63 : vector<8x8xf32>
    %cst_55 = arith.constant 1.000000e+00 : f32
    %68 = vector.broadcast %cst_55 : f32 to vector<8x8xf32>
    %69 = arith.divf %68, %67 : vector<8x8xf32>
    %c0_56 = arith.constant 0 : index
    %c64 = arith.constant 64 : index
    %70 = vector.load %arg7[%c0_56, %c64] : memref<8x96xf32, #tpu.memory_space<vmem>>, vector<8x8xf32>
    %c0_57 = arith.constant 0 : index
    %c0_58 = arith.constant 0 : index
    %c0_59 = arith.constant 0 : index
    %71 = vector.load %arg8[%c0_57, %c0_58, %c0_59] : memref<4x8x8xf32, #tpu.memory_space<vmem>>, vector<1x8x8xf32>
    %72 = vector.shape_cast %71 : vector<1x8x8xf32> to vector<8x8xf32>
    %73 = arith.mulf %72, %69 : vector<8x8xf32>
    %cst_60 = arith.constant dense<0.000000e+00> : vector<8x8xf32>
    %74 = tpu.matmul %73, %70, %cst_60 {dimension_numbers = #tpu.dot_dimension_numbers<[1], [0], [0], [1], [0, 0, 1, 1], [], []>} : vector<8x8xf32>, vector<8x8xf32>, vector<8x8xf32> -> vector<8x8xf32>
    %c0_61 = arith.constant 0 : index
    %c0_62 = arith.constant 0 : index
    %75 = vector.load %arg9[%c0_61, %c0_62] : memref<8x32xf32, #tpu.memory_space<vmem>>, vector<8x8xf32>
    tpu.vector_store %arg9[%c0_61, %c0_62], %74 {strides = array<i32>} : memref<8x32xf32, #tpu.memory_space<vmem>>, vector<8x8xf32>,
    %c0_63 = arith.constant 0 : index
    %c72 = arith.constant 72 : index
    %76 = vector.load %arg7[%c0_63, %c72] : memref<8x96xf32, #tpu.memory_space<vmem>>, vector<8x8xf32>
    %c1_64 = arith.constant 1 : index
    %c0_65 = arith.constant 0 : index
    %c0_66 = arith.constant 0 : index
    %77 = vector.load %arg8[%c1_64, %c0_65, %c0_66] : memref<4x8x8xf32, #tpu.memory_space<vmem>>, vector<1x8x8xf32>
    %78 = vector.shape_cast %77 : vector<1x8x8xf32> to vector<8x8xf32>
    %79 = arith.mulf %78, %69 : vector<8x8xf32>
    %cst_67 = arith.constant dense<0.000000e+00> : vector<8x8xf32>
    %80 = tpu.matmul %79, %76, %cst_67 {dimension_numbers = #tpu.dot_dimension_numbers<[1], [0], [0], [1], [0, 0, 1, 1], [], []>} : vector<8x8xf32>, vector<8x8xf32>, vector<8x8xf32> -> vector<8x8xf32>
    %c0_68 = arith.constant 0 : index
    %c8_69 = arith.constant 8 : index
    %81 = vector.load %arg9[%c0_68, %c8_69] : memref<8x32xf32, #tpu.memory_space<vmem>>, vector<8x8xf32>
    tpu.vector_store %arg9[%c0_68, %c8_69], %80 {strides = array<i32>} : memref<8x32xf32, #tpu.memory_space<vmem>>, vector<8x8xf32>,
    %c0_70 = arith.constant 0 : index
    %c80 = arith.constant 80 : index
    %82 = vector.load %arg7[%c0_70, %c80] : memref<8x96xf32, #tpu.memory_space<vmem>>, vector<8x8xf32>
    %c2_71 = arith.constant 2 : index
    %c0_72 = arith.constant 0 : index
    %c0_73 = arith.constant 0 : index
    %83 = vector.load %arg8[%c2_71, %c0_72, %c0_73] : memref<4x8x8xf32, #tpu.memory_space<vmem>>, vector<1x8x8xf32>
    %84 = vector.shape_cast %83 : vector<1x8x8xf32> to vector<8x8xf32>
    %85 = arith.mulf %84, %69 : vector<8x8xf32>
    %cst_74 = arith.constant dense<0.000000e+00> : vector<8x8xf32>
    %86 = tpu.matmul %85, %82, %cst_74 {dimension_numbers = #tpu.dot_dimension_numbers<[1], [0], [0], [1], [0, 0, 1, 1], [], []>} : vector<8x8xf32>, vector<8x8xf32>, vector<8x8xf32> -> vector<8x8xf32>
    %c0_75 = arith.constant 0 : index
    %c16_76 = arith.constant 16 : index
    %87 = vector.load %arg9[%c0_75, %c16_76] : memref<8x32xf32, #tpu.memory_space<vmem>>, vector<8x8xf32>
    tpu.vector_store %arg9[%c0_75, %c16_76], %86 {strides = array<i32>} : memref<8x32xf32, #tpu.memory_space<vmem>>, vector<8x8xf32>,
    %c0_77 = arith.constant 0 : index
    %c88 = arith.constant 88 : index
    %88 = vector.load %arg7[%c0_77, %c88] : memref<8x96xf32, #tpu.memory_space<vmem>>, vector<8x8xf32>
    %c3_78 = arith.constant 3 : index
    %c0_79 = arith.constant 0 : index
    %c0_80 = arith.constant 0 : index
    %89 = vector.load %arg8[%c3_78, %c0_79, %c0_80] : memref<4x8x8xf32, #tpu.memory_space<vmem>>, vector<1x8x8xf32>
    %90 = vector.shape_cast %89 : vector<1x8x8xf32> to vector<8x8xf32>
    %91 = arith.mulf %90, %69 : vector<8x8xf32>
    %cst_81 = arith.constant dense<0.000000e+00> : vector<8x8xf32>
    %92 = tpu.matmul %91, %88, %cst_81 {dimension_numbers = #tpu.dot_dimension_numbers<[1], [0], [0], [1], [0, 0, 1, 1], [], []>} : vector<8x8xf32>, vector<8x8xf32>, vector<8x8xf32> -> vector<8x8xf32>
    %c0_82 = arith.constant 0 : index
    %c24_83 = arith.constant 24 : index
    %93 = vector.load %arg9[%c0_82, %c24_83] : memref<8x32xf32, #tpu.memory_space<vmem>>, vector<8x8xf32>
    tpu.vector_store %arg9[%c0_82, %c24_83], %92 {strides = array<i32>} : memref<8x32xf32, #tpu.memory_space<vmem>>, vector<8x8xf32>,
    %c0_84 = arith.constant 0 : index
    %c0_85 = arith.constant 0 : index
    %94 = vector.load %arg9[%c0_84, %c0_85] : memref<8x32xf32, #tpu.memory_space<vmem>>, vector<8x32xf32>
    %c0_86 = arith.constant 0 : index
    %c0_87 = arith.constant 0 : index
    %95 = vector.load %arg4[%c0_86, %c0_87] : memref<32x32xf32, #tpu.memory_space<vmem>>, vector<32x32xf32>
    %cst_88 = arith.constant dense<0.000000e+00> : vector<8x32xf32>
    %96 = tpu.matmul %94, %95, %cst_88 {dimension_numbers = #tpu.dot_dimension_numbers<[1], [0], [0], [1], [0, 0, 1, 1], [], []>} : vector<8x32xf32>, vector<32x32xf32>, vector<8x32xf32> -> vector<8x32xf32>
    %c0_89 = arith.constant 0 : index
    %c0_90 = arith.constant 0 : index
    %97 = vector.load %arg5[%c0_89, %c0_90] : memref<1x32xf32, #tpu.memory_space<vmem>>, vector<1x32xf32>
    %98 = vector.broadcast %97 : vector<1x32xf32> to vector<8x32xf32>
    %99 = arith.addf %96, %98 : vector<8x32xf32>
    %c0_91 = arith.constant 0 : index
    %c0_92 = arith.constant 0 : index
    %c0_93 = arith.constant 0 : index
    %100 = vector.load %arg6[%c0_91, %c0_92, %c0_93] : memref<1x8x32xf32, #tpu.memory_space<vmem>>, vector<1x8x32xf32>
    %101 = vector.shape_cast %100 : vector<1x8x32xf32> to vector<8x32xf32>
    %102 = vector.shape_cast %99 : vector<8x32xf32> to vector<1x8x32xf32>
    tpu.vector_store %arg6[%c0_91, %c0_92, %c0_93], %102 {strides = array<i32>} : memref<1x8x32xf32, #tpu.memory_space<vmem>>, vector<1x8x32xf32>,
    return
  }
  func.func @transform_0(%arg0: i32) -> (i32, i32, i32) {
    %c0_i32 = arith.constant 0 : i32
    %c0_i32_0 = arith.constant 0 : i32
    %c0_i32_1 = arith.constant 0 : i32
    return %arg0, %c0_i32, %c0_i32_0 : i32, i32, i32
  }
  func.func @transform_1(%arg0: i32) -> (i32, i32) {
    %c0_i32 = arith.constant 0 : i32
    %c0_i32_0 = arith.constant 0 : i32
    %c0_i32_1 = arith.constant 0 : i32
    return %c0_i32, %c0_i32_0 : i32, i32
  }
  func.func @transform_2(%arg0: i32) -> (i32, i32) {
    %c0_i32 = arith.constant 0 : i32
    %c0_i32_0 = arith.constant 0 : i32
    %c0_i32_1 = arith.constant 0 : i32
    return %c0_i32, %c0_i32_0 : i32, i32
  }
  func.func @transform_3(%arg0: i32) -> (i32, i32) {
    %c0_i32 = arith.constant 0 : i32
    %c0_i32_0 = arith.constant 0 : i32
    %c0_i32_1 = arith.constant 0 : i32
    return %c0_i32, %c0_i32_0 : i32, i32
  }
  func.func @transform_4(%arg0: i32) -> (i32, i32) {
    %c0_i32 = arith.constant 0 : i32
    %c0_i32_0 = arith.constant 0 : i32
    %c0_i32_1 = arith.constant 0 : i32
    return %c0_i32, %c0_i32_0 : i32, i32
  }
  func.func @transform_5(%arg0: i32) -> (i32, i32, i32) {
    %c0_i32 = arith.constant 0 : i32
    %c0_i32_0 = arith.constant 0 : i32
    %c0_i32_1 = arith.constant 0 : i32
    return %arg0, %c0_i32, %c0_i32_0 : i32, i32, i32
  }
}

module attributes {stable_mosaic.version = 11 : i64} {
  func.func @_attention_kernel(%arg0: i32, %arg1: memref<1x8x32xf32, #tpu.memory_space<vmem>>, %arg2: memref<32x96xf32, #tpu.memory_space<vmem>>, %arg3: memref<1x96xf32, #tpu.memory_space<vmem>>, %arg4: memref<32x32xf32, #tpu.memory_space<vmem>>, %arg5: memref<1x32xf32, #tpu.memory_space<vmem>>, %arg6: memref<1x8x32xf32, #tpu.memory_space<vmem>>, %arg7: memref<8x96xf32, #tpu.memory_space<vmem>>, %arg8: memref<4x8x8xf32, #tpu.memory_space<vmem>>, %arg9: memref<8x32xf32, #tpu.memory_space<vmem>>) attributes {dimension_semantics = [#tpu.dimension_semantics<parallel>], iteration_bounds = array<i64: 2>, scalar_prefetch = 0 : i64, scratch_operands = 3 : i64, tpu.core_type = #tpu.core_type<tc>, window_params = [{transform_indices = @transform_0, window_bounds = array<i64: 1, 8, 32>}, {pipeline_mode = #tpu.pipeline_mode<synchronous>, transform_indices = @transform_1, window_bounds = array<i64: 32, 96>}, {pipeline_mode = #tpu.pipeline_mode<synchronous>, transform_indices = @transform_2, window_bounds = array<i64: 1, 96>}, {pipeline_mode = #tpu.pipeline_mode<synchronous>, transform_indices = @transform_3, window_bounds = array<i64: 32, 32>}, {pipeline_mode = #tpu.pipeline_mode<synchronous>, transform_indices = @transform_4, window_bounds = array<i64: 1, 32>}, {transform_indices = @transform_5, window_bounds = array<i64: 1, 8, 32>}]} {
    %c0 = arith.constant 0 : index
    %c0_0 = arith.constant 0 : index
    %c0_1 = arith.constant 0 : index
    %0 = vector.load %arg1[%c0, %c0_0, %c0_1] : memref<1x8x32xf32, #tpu.memory_space<vmem>>, vector<1x8x32xf32>
    %1 = vector.shape_cast %0 : vector<1x8x32xf32> to vector<8x32xf32>
    %c0_2 = arith.constant 0 : index
    %c0_3 = arith.constant 0 : index
    %2 = vector.load %arg2[%c0_2, %c0_3] : memref<32x96xf32, #tpu.memory_space<vmem>>, vector<32x96xf32>
    %cst = arith.constant dense<0.000000e+00> : vector<8x96xf32>
    %3 = tpu.matmul %1, %2, %cst {dimension_numbers = #tpu.dot_dimension_numbers<[1], [0], [0], [1], [0, 0, 1, 1], [], []>} : vector<8x32xf32>, vector<32x96xf32>, vector<8x96xf32> -> vector<8x96xf32>
    %c0_4 = arith.constant 0 : index
    %c0_5 = arith.constant 0 : index
    %4 = vector.load %arg3[%c0_4, %c0_5] : memref<1x96xf32, #tpu.memory_space<vmem>>, vector<1x96xf32>
    %5 = vector.broadcast %4 : vector<1x96xf32> to vector<8x96xf32>
    %6 = arith.addf %3, %5 : vector<8x96xf32>
    %c0_6 = arith.constant 0 : index
    %c0_7 = arith.constant 0 : index
    %7 = vector.load %arg7[%c0_6, %c0_7] : memref<8x96xf32, #tpu.memory_space<vmem>>, vector<8x96xf32>
    tpu.vector_store %arg7[%c0_6, %c0_7], %6 {strides = array<i32>} : memref<8x96xf32, #tpu.memory_space<vmem>>, vector<8x96xf32>,
    %c0_8 = arith.constant 0 : index
    %c0_9 = arith.constant 0 : index
    %8 = vector.load %arg7[%c0_8, %c0_9] : memref<8x96xf32, #tpu.memory_space<vmem>>, vector<8x8xf32>
    %c0_10 = arith.constant 0 : index
    %c32 = arith.constant 32 : index
    %9 = vector.load %arg7[%c0_10, %c32] : memref<8x96xf32, #tpu.memory_space<vmem>>, vector<8x8xf32>
    %cst_11 = arith.constant dense<0.000000e+00> : vector<8x8xf32>
    %10 = tpu.matmul %8, %9, %cst_11 {dimension_numbers = #tpu.dot_dimension_numbers<[1], [1], [0], [0], [0, 0, 1, 0], [], []>} : vector<8x8xf32>, vector<8x8xf32>, vector<8x8xf32> -> vector<8x8xf32>
    %c0_12 = arith.constant 0 : index
    %c0_13 = arith.constant 0 : index
    %c0_14 = arith.constant 0 : index
    %11 = vector.load %arg8[%c0_12, %c0_13, %c0_14] : memref<4x8x8xf32, #tpu.memory_space<vmem>>, vector<1x8x8xf32>
    %12 = vector.shape_cast %11 : vector<1x8x8xf32> to vector<8x8xf32>
    %13 = vector.shape_cast %10 : vector<8x8xf32> to vector<1x8x8xf32>
    tpu.vector_store %arg8[%c0_12, %c0_13, %c0_14], %13 {strides = array<i32>} : memref<4x8x8xf32, #tpu.memory_space<vmem>>, vector<1x8x8xf32>,
    %c0_15 = arith.constant 0 : index
    %c8 = arith.constant 8 : index
    %14 = vector.load %arg7[%c0_15, %c8] : memref<8x96xf32, #tpu.memory_space<vmem>>, vector<8x8xf32>
    %c0_16 = arith.constant 0 : index
    %c40 = arith.constant 40 : index
    %15 = vector.load %arg7[%c0_16, %c40] : memref<8x96xf32, #tpu.memory_space<vmem>>, vector<8x8xf32>
    %cst_17 = arith.constant dense<0.000000e+00> : vector<8x8xf32>
    %16 = tpu.matmul %14, %15, %cst_17 {dimension_numbers = #tpu.dot_dimension_numbers<[1], [1], [0], [0], [0, 0, 1, 0], [], []>} : vector<8x8xf32>, vector<8x8xf32>, vector<8x8xf32> -> vector<8x8xf32>
    %c1 = arith.constant 1 : index
    %c0_18 = arith.constant 0 : index
    %c0_19 = arith.constant 0 : index
    %17 = vector.load %arg8[%c1, %c0_18, %c0_19] : memref<4x8x8xf32, #tpu.memory_space<vmem>>, vector<1x8x8xf32>
    %18 = vector.shape_cast %17 : vector<1x8x8xf32> to vector<8x8xf32>
    %19 = vector.shape_cast %16 : vector<8x8xf32> to vector<1x8x8xf32>
    tpu.vector_store %arg8[%c1, %c0_18, %c0_19], %19 {strides = array<i32>} : memref<4x8x8xf32, #tpu.memory_space<vmem>>, vector<1x8x8xf32>,
    %20 = arith.maximumf %10, %16 : vector<8x8xf32>
    %c0_20 = arith.constant 0 : index
    %c16 = arith.constant 16 : index
    %21 = vector.load %arg7[%c0_20, %c16] : memref<8x96xf32, #tpu.memory_space<vmem>>, vector<8x8xf32>
    %c0_21 = arith.constant 0 : index
    %c48 = arith.constant 48 : index
    %22 = vector.load %arg7[%c0_21, %c48] : memref<8x96xf32, #tpu.memory_space<vmem>>, vector<8x8xf32>
    %cst_22 = arith.constant dense<0.000000e+00> : vector<8x8xf32>
    %23 = tpu.matmul %21, %22, %cst_22 {dimension_numbers = #tpu.dot_dimension_numbers<[1], [1], [0], [0], [0, 0, 1, 0], [], []>} : vector<8x8xf32>, vector<8x8xf32>, vector<8x8xf32> -> vector<8x8xf32>
    %c2 = arith.constant 2 : index
    %c0_23 = arith.constant 0 : index
    %c0_24 = arith.constant 0 : index
    %24 = vector.load %arg8[%c2, %c0_23, %c0_24] : memref<4x8x8xf32, #tpu.memory_space<vmem>>, vector<1x8x8xf32>
    %25 = vector.shape_cast %24 : vector<1x8x8xf32> to vector<8x8xf32>
    %26 = vector.shape_cast %23 : vector<8x8xf32> to vector<1x8x8xf32>
    tpu.vector_store %arg8[%c2, %c0_23, %c0_24], %26 {strides = array<i32>} : memref<4x8x8xf32, #tpu.memory_space<vmem>>, vector<1x8x8xf32>,
    %27 = arith.maximumf %20, %23 : vector<8x8xf32>
    %c0_25 = arith.constant 0 : index
    %c24 = arith.constant 24 : index
    %28 = vector.load %arg7[%c0_25, %c24] : memref<8x96xf32, #tpu.memory_space<vmem>>, vector<8x8xf32>
    %c0_26 = arith.constant 0 : index
    %c56 = arith.constant 56 : index
    %29 = vector.load %arg7[%c0_26, %c56] : memref<8x96xf32, #tpu.memory_space<vmem>>, vector<8x8xf32>
    %cst_27 = arith.constant dense<0.000000e+00> : vector<8x8xf32>
    %30 = tpu.matmul %28, %29, %cst_27 {dimension_numbers = #tpu.dot_dimension_numbers<[1], [1], [0], [0], [0, 0, 1, 0], [], []>} : vector<8x8xf32>, vector<8x8xf32>, vector<8x8xf32> -> vector<8x8xf32>
    %c3 = arith.constant 3 : index
    %c0_28 = arith.constant 0 : index
    %c0_29 = arith.constant 0 : index
    %31 = vector.load %arg8[%c3, %c0_28, %c0_29] : memref<4x8x8xf32, #tpu.memory_space<vmem>>, vector<1x8x8xf32>
    %32 = vector.shape_cast %31 : vector<1x8x8xf32> to vector<8x8xf32>
    %33 = vector.shape_cast %30 : vector<8x8xf32> to vector<1x8x8xf32>
    tpu.vector_store %arg8[%c3, %c0_28, %c0_29], %33 {strides = array<i32>} : memref<4x8x8xf32, #tpu.memory_space<vmem>>, vector<1x8x8xf32>,
    %34 = arith.maximumf %27, %30 : vector<8x8xf32>
    %cst_30 = arith.constant 0.000000e+00 : f32
    %35 = vector.broadcast %cst_30 : f32 to vector<8x8xf32>
    %c0_31 = arith.constant 0 : index
    %c0_32 = arith.constant 0 : index
    %c0_33 = arith.constant 0 : index
    %36 = vector.load %arg8[%c0_31, %c0_32, %c0_33] : memref<4x8x8xf32, #tpu.memory_space<vmem>>, vector<1x8x8xf32>
    %37 = vector.shape_cast %36 : vector<1x8x8xf32> to vector<8x8xf32>
    %38 = arith.subf %37, %34 : vector<8x8xf32>
    %39 = math.exp %38 : vector<8x8xf32>
    %c0_34 = arith.constant 0 : index
    %c0_35 = arith.constant 0 : index
    %c0_36 = arith.constant 0 : index
    %40 = vector.load %arg8[%c0_34, %c0_35, %c0_36] : memref<4x8x8xf32, #tpu.memory_space<vmem>>, vector<1x8x8xf32>
    %41 = vector.shape_cast %40 : vector<1x8x8xf32> to vector<8x8xf32>
    %42 = vector.shape_cast %39 : vector<8x8xf32> to vector<1x8x8xf32>
    tpu.vector_store %arg8[%c0_34, %c0_35, %c0_36], %42 {strides = array<i32>} : memref<4x8x8xf32, #tpu.memory_space<vmem>>, vector<1x8x8xf32>,
    %43 = arith.addf %35, %39 : vector<8x8xf32>
    %c1_37 = arith.constant 1 : index
    %c0_38 = arith.constant 0 : index
    %c0_39 = arith.constant 0 : index
    %44 = vector.load %arg8[%c1_37, %c0_38, %c0_39] : memref<4x8x8xf32, #tpu.memory_space<vmem>>, vector<1x8x8xf32>
    %45 = vector.shape_cast %44 : vector<1x8x8xf32> to vector<8x8xf32>
    %46 = arith.subf %45, %34 : vector<8x8xf32>
    %47 = math.exp %46 : vector<8x8xf32>
    %c1_40 = arith.constant 1 : index
    %c0_41 = arith.constant 0 : index
    %c0_42 = arith.constant 0 : index
    %48 = vector.load %arg8[%c1_40, %c0_41, %c0_42] : memref<4x8x8xf32, #tpu.memory_space<vmem>>, vector<1x8x8xf32>
    %49 = vector.shape_cast %48 : vector<1x8x8xf32> to vector<8x8xf32>
    %50 = vector.shape_cast %47 : vector<8x8xf32> to vector<1x8x8xf32>
    tpu.vector_store %arg8[%c1_40, %c0_41, %c0_42], %50 {strides = array<i32>} : memref<4x8x8xf32, #tpu.memory_space<vmem>>, vector<1x8x8xf32>,
    %51 = arith.addf %43, %47 : vector<8x8xf32>
    %c2_43 = arith.constant 2 : index
    %c0_44 = arith.constant 0 : index
    %c0_45 = arith.constant 0 : index
    %52 = vector.load %arg8[%c2_43, %c0_44, %c0_45] : memref<4x8x8xf32, #tpu.memory_space<vmem>>, vector<1x8x8xf32>
    %53 = vector.shape_cast %52 : vector<1x8x8xf32> to vector<8x8xf32>
    %54 = arith.subf %53, %34 : vector<8x8xf32>
    %55 = math.exp %54 : vector<8x8xf32>
    %c2_46 = arith.constant 2 : index
    %c0_47 = arith.constant 0 : index
    %c0_48 = arith.constant 0 : index
    %56 = vector.load %arg8[%c2_46, %c0_47, %c0_48] : memref<4x8x8xf32, #tpu.memory_space<vmem>>, vector<1x8x8xf32>
    %57 = vector.shape_cast %56 : vector<1x8x8xf32> to vector<8x8xf32>
    %58 = vector.shape_cast %55 : vector<8x8xf32> to vector<1x8x8xf32>
    tpu.vector_store %arg8[%c2_46, %c0_47, %c0_48], %58 {strides = array<i32>} : memref<4x8x8xf32, #tpu.memory_space<vmem>>, vector<1x8x8xf32>,
    %59 = arith.addf %51, %55 : vector<8x8xf32>
    %c3_49 = arith.constant 3 : index
    %c0_50 = arith.constant 0 : index
    %c0_51 = arith.constant 0 : index
    %60 = vector.load %arg8[%c3_49, %c0_50, %c0_51] : memref<4x8x8xf32, #tpu.memory_space<vmem>>, vector<1x8x8xf32>
    %61 = vector.shape_cast %60 : vector<1x8x8xf32> to vector<8x8xf32>
    %62 = arith.subf %61, %34 : vector<8x8xf32>
    %63 = math.exp %62 : vector<8x8xf32>
    %c3_52 = arith.constant 3 : index
    %c0_53 = arith.constant 0 : index
    %c0_54 = arith.constant 0 : index
    %64 = vector.load %arg8[%c3_52, %c0_53, %c0_54] : memref<4x8x8xf32, #tpu.memory_space<vmem>>, vector<1x8x8xf32>
    %65 = vector.shape_cast %64 : vector<1x8x8xf32> to vector<8x8xf32>
    %66 = vector.shape_cast %63 : vector<8x8xf32> to vector<1x8x8xf32>
    tpu.vector_store %arg8[%c3_52, %c0_53, %c0_54], %66 {strides = array<i32>} : memref<4x8x8xf32, #tpu.memory_space<vmem>>, vector<1x8x8xf32>,
    %67 = arith.addf %59, %63 : vector<8x8xf32>
    %cst_55 = arith.constant 1.000000e+00 : f32
    %68 = vector.broadcast %cst_55 : f32 to vector<8x8xf32>
    %69 = arith.divf %68, %67 : vector<8x8xf32>
    %c0_56 = arith.constant 0 : index
    %c64 = arith.constant 64 : index
    %70 = vector.load %arg7[%c0_56, %c64] : memref<8x96xf32, #tpu.memory_space<vmem>>, vector<8x8xf32>
    %c0_57 = arith.constant 0 : index
    %c0_58 = arith.constant 0 : index
    %c0_59 = arith.constant 0 : index
    %71 = vector.load %arg8[%c0_57, %c0_58, %c0_59] : memref<4x8x8xf32, #tpu.memory_space<vmem>>, vector<1x8x8xf32>
    %72 = vector.shape_cast %71 : vector<1x8x8xf32> to vector<8x8xf32>
    %73 = arith.mulf %72, %69 : vector<8x8xf32>
    %cst_60 = arith.constant dense<0.000000e+00> : vector<8x8xf32>
    %74 = tpu.matmul %73, %70, %cst_60 {dimension_numbers = #tpu.dot_dimension_numbers<[1], [0], [0], [1], [0, 0, 1, 1], [], []>} : vector<8x8xf32>, vector<8x8xf32>, vector<8x8xf32> -> vector<8x8xf32>
    %c0_61 = arith.constant 0 : index
    %c0_62 = arith.constant 0 : index
    %75 = vector.load %arg9[%c0_61, %c0_62] : memref<8x32xf32, #tpu.memory_space<vmem>>, vector<8x8xf32>
    tpu.vector_store %arg9[%c0_61, %c0_62], %74 {strides = array<i32>} : memref<8x32xf32, #tpu.memory_space<vmem>>, vector<8x8xf32>,
    %c0_63 = arith.constant 0 : index
    %c72 = arith.constant 72 : index
    %76 = vector.load %arg7[%c0_63, %c72] : memref<8x96xf32, #tpu.memory_space<vmem>>, vector<8x8xf32>
    %c1_64 = arith.constant 1 : index
    %c0_65 = arith.constant 0 : index
    %c0_66 = arith.constant 0 : index
    %77 = vector.load %arg8[%c1_64, %c0_65, %c0_66] : memref<4x8x8xf32, #tpu.memory_space<vmem>>, vector<1x8x8xf32>
    %78 = vector.shape_cast %77 : vector<1x8x8xf32> to vector<8x8xf32>
    %79 = arith.mulf %78, %69 : vector<8x8xf32>
    %cst_67 = arith.constant dense<0.000000e+00> : vector<8x8xf32>
    %80 = tpu.matmul %79, %76, %cst_67 {dimension_numbers = #tpu.dot_dimension_numbers<[1], [0], [0], [1], [0, 0, 1, 1], [], []>} : vector<8x8xf32>, vector<8x8xf32>, vector<8x8xf32> -> vector<8x8xf32>
    %c0_68 = arith.constant 0 : index
    %c8_69 = arith.constant 8 : index
    %81 = vector.load %arg9[%c0_68, %c8_69] : memref<8x32xf32, #tpu.memory_space<vmem>>, vector<8x8xf32>
    tpu.vector_store %arg9[%c0_68, %c8_69], %80 {strides = array<i32>} : memref<8x32xf32, #tpu.memory_space<vmem>>, vector<8x8xf32>,
    %c0_70 = arith.constant 0 : index
    %c80 = arith.constant 80 : index
    %82 = vector.load %arg7[%c0_70, %c80] : memref<8x96xf32, #tpu.memory_space<vmem>>, vector<8x8xf32>
    %c2_71 = arith.constant 2 : index
    %c0_72 = arith.constant 0 : index
    %c0_73 = arith.constant 0 : index
    %83 = vector.load %arg8[%c2_71, %c0_72, %c0_73] : memref<4x8x8xf32, #tpu.memory_space<vmem>>, vector<1x8x8xf32>
    %84 = vector.shape_cast %83 : vector<1x8x8xf32> to vector<8x8xf32>
    %85 = arith.mulf %84, %69 : vector<8x8xf32>
    %cst_74 = arith.constant dense<0.000000e+00> : vector<8x8xf32>
    %86 = tpu.matmul %85, %82, %cst_74 {dimension_numbers = #tpu.dot_dimension_numbers<[1], [0], [0], [1], [0, 0, 1, 1], [], []>} : vector<8x8xf32>, vector<8x8xf32>, vector<8x8xf32> -> vector<8x8xf32>
    %c0_75 = arith.constant 0 : index
    %c16_76 = arith.constant 16 : index
    %87 = vector.load %arg9[%c0_75, %c16_76] : memref<8x32xf32, #tpu.memory_space<vmem>>, vector<8x8xf32>
    tpu.vector_store %arg9[%c0_75, %c16_76], %86 {strides = array<i32>} : memref<8x32xf32, #tpu.memory_space<vmem>>, vector<8x8xf32>,
    %c0_77 = arith.constant 0 : index
    %c88 = arith.constant 88 : index
    %88 = vector.load %arg7[%c0_77, %c88] : memref<8x96xf32, #tpu.memory_space<vmem>>, vector<8x8xf32>
    %c3_78 = arith.constant 3 : index
    %c0_79 = arith.constant 0 : index
    %c0_80 = arith.constant 0 : index
    %89 = vector.load %arg8[%c3_78, %c0_79, %c0_80] : memref<4x8x8xf32, #tpu.memory_space<vmem>>, vector<1x8x8xf32>
    %90 = vector.shape_cast %89 : vector<1x8x8xf32> to vector<8x8xf32>
    %91 = arith.mulf %90, %69 : vector<8x8xf32>
    %cst_81 = arith.constant dense<0.000000e+00> : vector<8x8xf32>
    %92 = tpu.matmul %91, %88, %cst_81 {dimension_numbers = #tpu.dot_dimension_numbers<[1], [0], [0], [1], [0, 0, 1, 1], [], []>} : vector<8x8xf32>, vector<8x8xf32>, vector<8x8xf32> -> vector<8x8xf32>
    %c0_82 = arith.constant 0 : index
    %c24_83 = arith.constant 24 : index
    %93 = vector.load %arg9[%c0_82, %c24_83] : memref<8x32xf32, #tpu.memory_space<vmem>>, vector<8x8xf32>
    tpu.vector_store %arg9[%c0_82, %c24_83], %92 {strides = array<i32>} : memref<8x32xf32, #tpu.memory_space<vmem>>, vector<8x8xf32>,
    %c0_84 = arith.constant 0 : index
    %c0_85 = arith.constant 0 : index
    %94 = vector.load %arg9[%c0_84, %c0_85] : memref<8x32xf32, #tpu.memory_space<vmem>>, vector<8x32xf32>
    %c0_86 = arith.constant 0 : index
    %c0_87 = arith.constant 0 : index
    %95 = vector.load %arg4[%c0_86, %c0_87] : memref<32x32xf32, #tpu.memory_space<vmem>>, vector<32x32xf32>
    %cst_88 = arith.constant dense<0.000000e+00> : vector<8x32xf32>
    %96 = tpu.matmul %94, %95, %cst_88 {dimension_numbers = #tpu.dot_dimension_numbers<[1], [0], [0], [1], [0, 0, 1, 1], [], []>} : vector<8x32xf32>, vector<32x32xf32>, vector<8x32xf32> -> vector<8x32xf32>
    %c0_89 = arith.constant 0 : index
    %c0_90 = arith.constant 0 : index
    %97 = vector.load %arg5[%c0_89, %c0_90] : memref<1x32xf32, #tpu.memory_space<vmem>>, vector<1x32xf32>
    %98 = vector.broadcast %97 : vector<1x32xf32> to vector<8x32xf32>
    %99 = arith.addf %96, %98 : vector<8x32xf32>
    %c0_91 = arith.constant 0 : index
    %c0_92 = arith.constant 0 : index
    %c0_93 = arith.constant 0 : index
    %100 = vector.load %arg6[%c0_91, %c0_92, %c0_93] : memref<1x8x32xf32, #tpu.memory_space<vmem>>, vector<1x8x32xf32>
    %101 = vector.shape_cast %100 : vector<1x8x32xf32> to vector<8x32xf32>
    %102 = vector.shape_cast %99 : vector<8x32xf32> to vector<1x8x32xf32>
    tpu.vector_store %arg6[%c0_91, %c0_92, %c0_93], %102 {strides = array<i32>} : memref<1x8x32xf32, #tpu.memory_space<vmem>>, vector<1x8x32xf32>,
    return
  }
  func.func @transform_0(%arg0: i32) -> (i32, i32, i32) {
    %c0_i32 = arith.constant 0 : i32
    %c0_i32_0 = arith.constant 0 : i32
    %c0_i32_1 = arith.constant 0 : i32
    return %arg0, %c0_i32, %c0_i32_0 : i32, i32, i32
  }
  func.func @transform_1(%arg0: i32) -> (i32, i32) {
    %c0_i32 = arith.constant 0 : i32
    %c0_i32_0 = arith.constant 0 : i32
    %c0_i32_1 = arith.constant 0 : i32
    return %c0_i32, %c0_i32_0 : i32, i32
  }
  func.func @transform_2(%arg0: i32) -> (i32, i32) {
    %c0_i32 = arith.constant 0 : i32
    %c0_i32_0 = arith.constant 0 : i32
    %c0_i32_1 = arith.constant 0 : i32
    return %c0_i32, %c0_i32_0 : i32, i32
  }
  func.func @transform_3(%arg0: i32) -> (i32, i32) {
    %c0_i32 = arith.constant 0 : i32
    %c0_i32_0 = arith.constant 0 : i32
    %c0_i32_1 = arith.constant 0 : i32
    return %c0_i32, %c0_i32_0 : i32, i32
  }
  func.func @transform_4(%arg0: i32) -> (i32, i32) {
    %c0_i32 = arith.constant 0 : i32
    %c0_i32_0 = arith.constant 0 : i32
    %c0_i32_1 = arith.constant 0 : i32
    return %c0_i32, %c0_i32_0 : i32, i32
  }
  func.func @transform_5(%arg0: i32) -> (i32, i32, i32) {
    %c0_i32 = arith.constant 0 : i32
    %c0_i32_0 = arith.constant 0 : i32
    %c0_i32_1 = arith.constant 0 : i32
    return %arg0, %c0_i32, %c0_i32_0 : i32, i32, i32
  }
}

</mosaic_0001>

<bundles_post_ra>
// kernel: attention_forward.1
= control target key start
LH: loop header
LB: loop body
LE: loop exit
PB: predicated region body
PF: predicated region fallthrough
CT: control target
= control target key end

     0   :  { %10 = vsyncpa [#allocation6], 0  ;;  %s1651_s0 = inlined_call_operand.vmem [shape: f32[2,8,32], index: 0, kind: input, shape index: {}]   ;;  %s1652_s1 = inlined_call_operand.vmem [shape: f32[32,96], index: 1, kind: input, shape index: {}]   ;;  %s1653_s2 = inlined_call_operand.vmem [shape: f32[1,96], index: 2, kind: input, shape index: {}]   ;;  %s1654_s3 = inlined_call_operand.vmem [shape: f32[32,32], index: 3, kind: input, shape index: {}]   ;;  %s1655_s4 = inlined_call_operand.vmem [shape: f32[1,32], index: 4, kind: input, shape index: {}]   ;;  %s1656_s5 = inlined_call_operand.hbm [shape: f32[2,8,32], index: 5, kind: output, shape index: {}]  }
   0x1   :  { %12 = vsyncpa [#allocation6 + $0x1], 0  ;;  %s1465_s18 = smov 0   ;;  %s1467_s19 = smov 0  }
   0x2   :  { %s1469_s20 = smov 0   ;;  %s1471_s21 = smov 0  }
   0x3 LB: > { %s1486_s22 = sadd.s32 4294967295, %s1415_s21   ;;  %s1161_s23 = sadd.s32 4294967294, %s1415_s21   ;;  %s1415_s21 = sphi %s1471_s21, %s1662_s21   ;;  %s1411_s20 = sphi %s1469_s20, %s1661_s20   ;;  %s1407_s19 = sphi %s1467_s19, %s1660_s19   ;;  %s1403_s18 = sphi %s1465_s18, %s1659_s18  }
   0x4   : > { %s1490_s24 = sadd.s32 1, %s1415_s21   ;;  %s135_s25 = sadd.s32 1, %s1411_s20 }
   0x5   : > { %s132_s26 = ssub.s32 %s1415_s21, %s1490_s24  ;;  %p145_p0 = scmp.ne.s32.totalorder %s1411_s20, %s1407_s19 }
   0x6   : > { %p133_p1 = scmp.eq.s32.totalorder %s132_s26, 0  ;;  %p146_p2 = scmp.eq.s32.totalorder %s1486_s22, 1 }
   0x7   : > { %p151_p3 = scmp.ne.s32.totalorder %s1407_s19, %s1403_s18  ;;  %p152_p4 = scmp.eq.s32.totalorder %s1161_s23, 1 }
   0x8   : > { %s1501_s27 = scalar_select %p133_p1, %s1411_s20, %s135_s25  }
   0x9   : > { %p1503_p5 = por %p146_p2, %p145_p0  ;;  %p1507_p6 = por %p152_p4, %p151_p3 }
   0xa   : > { %p1164_p7 = scmp.ge.s32.totalorder %s1415_s21, 1  ;;  %p189_p8 = scmp.lt.s32.totalorder %s1415_s21, 3 }
   0xc   : > { %p190_p9 = pnand %p1164_p7, %p189_p8 }
   0xd   : > { %v221_v0 = vld [vmem:[%s1652_s1] sm:$0xff] (!%p190_p9)  ;;  %v222_v1 = vld [vmem:[%s1652_s1 + $0x8] sm:$0xff] (!%p190_p9)  ;;  %v223_v2 = vld [vmem:[%s1652_s1 + $0x10] sm:$0xff] (!%p190_p9)  ;;  %v1417_v3 = vmov (!%p190_p9), 0.0|0.0   ;;  %vm1418_vm0 = vmmov (!%p190_p9), 0   ;;  %v1419_v6 = vmov (!%p190_p9), 0.0  }
   0xe   : > { %193 = sbr.rel (%p190_p9) target bundleno = 1196 (0x4ac), region = 40  ;;  %1275 = vmatprep.subr.bf16.mxu0 (!%p190_p9), %v1417_v3  ;;  %v1276_v4 = vpack.c.bf16 (!%p190_p9), %v222_v1, %v221_v0  ;;  %v224_v5 = vld [vmem:[%s1652_s1 + $0x18] sm:$0xff] (!%p190_p9)  ;;  %1221 = vmatprep.mubr.msk.f32.mxu0 (!%p190_p9), %vm1418_vm0, %v1419_v6  ;;  %p216_p10 = scmp.lt.s32.totalorder (!%p190_p9), %s1486_s22, 1  ;;  %vm232_vm1 = vcmask (!%p190_p9), 261120   ;;  %v1167_v9 = vld [vmem:[%s1653_s2] ss:$0 sm:$0xff] (!%p190_p9) }
   0xf   : > { %1224 = vmatprep.subr.mxu1 (!%p190_p9), %v1419_v6  ;;  %1226 = vmatprep.mubr.msk.f32.mxu1 (!%p190_p9), %vm1418_vm0, %v1419_v6  ;;  %v1279_v7 = vpack.c.bf16 (!%p190_p9), %v224_v5, %v223_v2  ;;  %vm306_vm2 = vcmask (!%p190_p9), 785408   ;;  %s1420_s26 = smov (!%p190_p9), 120   ;;  %s1421_s30 = smov (!%p190_p9), 96   ;;  %vm312_vm3 = vcmask (!%p190_p9), 64512   ;;  %v1003_v0 = vld [vmem:[%s1654_s3] sm:$0xff] (!%p190_p9)  ;;  %v1004_v1 = vld [vmem:[%s1654_s3 + $0x8] sm:$0xff] (!%p190_p9) }
  0x10   : > { %1277 = vmatpush3.bf16.msra.mxu0 (!%p190_p9), %v1276_v4  ;;  %s1422_s6 = smov (!%p190_p9), 80   ;;  %s1423_s7 = smov (!%p190_p9), 88   ;;  %v1282_v2 = vpack.c.bf16 (!%p190_p9), %v1004_v1, %v1003_v0  ;;  %v1005_v4 = vld [vmem:[%s1654_s3 + $0x10] sm:$0xff] (!%p190_p9)  ;;  %v1006_v5 = vld [vmem:[%s1654_s3 + $0x18] sm:$0xff] (!%p190_p9)  ;;  %vm828_vm4 = vcmask (!%p190_p9), 130112   ;;  %vm914_vm5 = vcmask (!%p190_p9), 195712  }
  0x11   : > { %1278 = vmatprep.subr.bf16.mxu0 (!%p190_p9), %v1417_v3  ;;  %s1424_s8 = smov (!%p190_p9), 72   ;;  %s1425_s9 = smov (!%p190_p9), 112   ;;  %vm1000_vm6 = vcmask (!%p190_p9), 261312  }
  0x12   : > { %s1426_s10 = smov (!%p190_p9), 64   ;;  %s1427_s11 = smov (!%p190_p9), 104  }
  0x13   : > { %s1428_s12 = smov (!%p190_p9), 48  }
  0x14   : > { %1280 = vmatpush3.bf16.msra.mxu0 (!%p190_p9), %v1279_v7  ;;  %v1285_v7 = vpack.c.bf16 (!%p190_p9), %v1006_v5, %v1005_v4 }
  0x15   : > { %s217_s13 = scalar_select %p216_p10, %s1486_s22, 1  ;;  %1244 = vmatprep.subr.mxu0 %v1419_v6 }
  0x17   : > { %s1166_s14 = sshll.u32 %s217_s13, 3  ;;  %s1429_s13 = smov 56  }
  0x18   : > { %s219_s17 = scalar_lea.vmem %s1651_s0, %s1166_s14  ;;  %s1430_s14 = smov 40  }
  0x19   : > { %v220_v8 = vld [vmem:[%s219_s17] sm:$0xff] }
  0x1a   : > { %1222 = vmatmul.mubr.msk.f32.vlgmr.msra.gmra.mrb[0].mxu0 %vm232_vm1, %v220_v8 }
  0x1b   : > { %1246 = vmatprep.mubr.msk.f32.mxu0 %vm1418_vm0, %v1419_v6 }
  0xed   : > { %v302_v10 = vpop.f32.mrb[0].mxu0 }
  0xee   : > { %v303_v11 = vadd.f32 %v1167_v9, %v302_v10  ;;  %v1223_v12 = vpop.f32.mrb[1].mxu0 }
  0xf0   : > { %307 = vst.msk [vmem:[#allocation2] sm:$0xff] %vm306_vm2, %v303_v11 }
  0xf7   : > { %v388_v13 = vld [vmem:[#allocation2] sm:$0xff] }
  0xf8   : > { %390 = vrot.lane.b32.xlu1 %v388_v13, %s1420_s26  ;;  %310 = vrot.lane.b32.xlu0 %v388_v13, %s1421_s30 }
  0xfc   : > { %475 = vrot.lane.b32.xlu1 %v388_v13, %s1422_s6  ;;  %392 = vrot.lane.b32.xlu0 %v388_v13, %s1423_s7  ;;  %s1431_s7 = smov 8  }
 0x100   : > { %558 = vrot.lane.b32.xlu1 %v388_v13, %s1424_s8  ;;  %473 = vrot.lane.b32.xlu0 %v388_v13, %s1425_s9  ;;  %s1432_s8 = smov 24   ;;  %s1433_s9 = smov 16  }
 0x104   : > { %667 = vrot.lane.b32.xlu1 %v388_v13, %s1426_s10  ;;  %556 = vrot.lane.b32.xlu0 %v388_v13, %s1427_s11  ;;  %s213_s10 = sand.u32 1, %s1407_s19  }
 0x105   : > { %s1165_s11 = sshll.u32 %s213_s10, 3  ;;  %s1089_s26 = scalar_lea.sflag [#allocation6], %s213_s10 }
 0x106   : > { %s215_s15 = scalar_lea.vmem [#allocation5], %s1165_s11 }
 0x107   : > { %s1102_s16 = sshll.u32 %s215_s15, 4  ;;  %s1610_s16 = int_to_ptr.vmem [resolvable:$true] %s1102_s16 }
 0x108   : > { %834 = vrot.lane.b32.xlu1 %v388_v13, %s1428_s12  ;;  %748 = vrot.lane.b32.xlu0 %v388_v13, %s1429_s13  ;;  %s1353_s30 = scalar_lea.vmem %s1610_s16, 128 }
 0x109   : > { %p1354_p11 = scmp.ne.s32.totalorder %s1610_s16, %s1353_s30 }
 0x10b   : > { %p1355_p12 = pnand %p1354_p11, %p1503_p5 }
 0x10c   : > { %920 = vrot.lane.b32.xlu0 %v388_v13, %s1430_s14  ;;  %s1184_s14 = sshll.u32 %s1486_s22, 7  ;;  %s1434_s22 = smov [#allocation5]  }
 0x10d   : > { %s1608_s25 = scalar_lea.hbm %s1656_s5, %s1184_s14  ;;  %p1356_p13 = pneg %p1355_p12 }
 0x10e   : > { %s1357_s6 = sshll.u32 %s1434_s22, 4  ;;  %s1358_s6 = int_to_ptr.vmem [resolvable:$false] %s1357_s6 }
 0x10f   : > { %p1360_p0 = scmp.lt.s32.totalorder %s1610_s16, %s1358_s6 }
 0x16a   : > { %v391_v14 = vpop.permute.xlu1 %390  ;;  %v311_v15 = vpop.permute.xlu0 %310 }
 0x16b   : > { %1225 = vmatpush3.xpose.msk.msra.mxu1 %vm312_vm3, %v311_v15 }
 0x16c   : > { %1229 = vmatprep.subr.mxu1 %v1419_v6 }
 0x16e   : > { %v476_v16 = vpop.permute.xlu1 %475  ;;  %1227 = vmatmul.mubr.msk.f32.vlgmr.msra.gmra.mrb[0].mxu1 %vm312_vm3, %v388_v13  ;;  %v393_v17 = vpop.permute.xlu0 %392 }
 0x16f   : > { %1230 = vmatpush3.xpose.msk.msra.mxu1 %vm312_vm3, %v393_v17  ;;  %1231 = vmatprep.mubr.msk.f32.mxu1 %vm1418_vm0, %v1419_v6 }
 0x170   : > { %1234 = vmatprep.subr.mxu1 %v1419_v6 }
 0x172   : > { %v559_v18 = vpop.permute.xlu1 %558  ;;  %1232 = vmatmul.mubr.msk.f32.vlgmr.msra.gmra.mrb[2].mxu1 %vm312_vm3, %v391_v14  ;;  %v474_v19 = vpop.permute.xlu0 %473 }
 0x173   : > { %1235 = vmatpush3.xpose.msk.msra.mxu1 %vm312_vm3, %v476_v16  ;;  %1236 = vmatprep.mubr.msk.f32.mxu1 %vm1418_vm0, %v1419_v6 }
 0x174   : > { %1239 = vmatprep.subr.mxu1 %v1419_v6 }
 0x176   : > { %v668_v20 = vpop.permute.xlu1 %667  ;;  %1237 = vmatmul.mubr.msk.f32.vlgmr.msra.gmra.mrb[4].mxu1 %vm312_vm3, %v474_v19  ;;  %v557_v21 = vpop.permute.xlu0 %556 }
 0x177   : > { %1240 = vmatpush3.xpose.msk.msra.mxu1 %vm312_vm3, %v559_v18  ;;  %1245 = vmatpush3.msra.mxu0 %v668_v20  ;;  %v1181_v18 = vld [vmem:[%s1655_s4] ss:$0 sm:$0xff] }
 0x178   : > { %1241 = vmatprep.mubr.msk.f32.mxu1 %vm1418_vm0, %v1419_v6  ;;  %1249 = vmatprep.subr.mxu1 %v1419_v6 }
 0x179   : > { %1254 = vmatprep.subr.mxu0 %v1419_v6 }
 0x17a   : > { %1242 = vmatmul.mubr.msk.f32.vlgmr.msra.gmra.mrb[6].mxu1 %vm312_vm3, %v557_v21  ;;  %v749_v22 = vpop.permute.xlu0 %748  ;;  %v835_v58 = vpop.permute.xlu1 %834 }
 0x17b   : > { %1250 = vmatpush3.msra.mxu1 %v749_v22  ;;  %1251 = vmatprep.mubr.msk.f32.mxu1 %vm1418_vm0, %v1419_v6 }
 0x17c   : > { %1259 = vmatprep.subr.mxu1 %v1419_v6 }
 0x17e   : > { %v921_v59 = vpop.permute.xlu0 %920 }
 0x241   : > { %v383_v23 = vpop.f32.mrb[0].mxu1 }
 0x242   : > { %387 = vst.msk [vmem:[#allocation3] sm:$0xff] %vm312_vm3, %v383_v23  ;;  %v1228_v24 = vpop.f32.mrb[1].mxu1 }
 0x245   : > { %v464_v25 = vpop.f32.mrb[2].mxu1 }
 0x246   : > { %469 = vst.msk [vmem:[#allocation3 + $0x8] sm:$0xff] %vm312_vm3, %v464_v25  ;;  %v470_v26 = vmax.f32 %v383_v23, %v464_v25  ;;  %v1233_v27 = vpop.f32.mrb[3].mxu1 }
 0x249   : > { %v547_v28 = vpop.f32.mrb[4].mxu1  ;;  %v637_v34 = vld [vmem:[#allocation3] sm:$0xff] }
 0x24a   : > { %552 = vst.msk [vmem:[#allocation3 + $0x10] sm:$0xff] %vm312_vm3, %v547_v28  ;;  %v553_v29 = vmax.f32 %v470_v26, %v547_v28  ;;  %v1238_v30 = vpop.f32.mrb[5].mxu1 }
 0x24d   : > { %v630_v31 = vpop.f32.mrb[6].mxu1  ;;  %v643_v35 = vld [vmem:[#allocation3 + $0x8] sm:$0xff] }
 0x24e   : > { %635 = vst.msk [vmem:[#allocation3 + $0x18] sm:$0xff] %vm312_vm3, %v630_v31  ;;  %v636_v32 = vmax.f32 %v553_v29, %v630_v31  ;;  %v1243_v33 = vpop.f32.mrb[7].mxu1 }
 0x250   : > { %v638_v36 = vsub.f32 %v637_v34, %v636_v32  ;;  %v644_v37 = vsub.f32 %v643_v35, %v636_v32 }
 0x251   : > { %v649_v38 = vld [vmem:[#allocation3 + $0x10] sm:$0xff] }
 0x252   : > { %v639_v39 = vmul.f32 1.442695, %v638_v36  ;;  %v645_v40 = vmul.f32 1.442695, %v644_v37  ;;  %v650_v41 = vsub.f32 %v649_v38, %v636_v32 }
 0x254   : > { %1343 = vpow2.f32 %v639_v39  ;;  %v651_v42 = vmul.f32 1.442695, %v650_v41 }
 0x255   : > { %1345 = vpow2.f32 %v645_v40  ;;  %v655_v43 = vld [vmem:[#allocation3 + $0x18] sm:$0xff] }
 0x256   : > { %1347 = vpow2.f32 %v651_v42  ;;  %v656_v44 = vsub.f32 %v655_v43, %v636_v32 }
 0x258   : > { %v657_v45 = vmul.f32 1.442695, %v656_v44 }
 0x25a   : > { %1349 = vpow2.f32 %v657_v45 }
 0x25e   : > { %v1344_v46 = vpop.eup %1343 }
 0x25f   : > { %v1346_v47 = vpop.eup %1345  ;;  %641 = vst.msk [vmem:[#allocation3] sm:$0xff] %vm312_vm3, %v1344_v46 }
 0x260   : > { %v1348_v48 = vpop.eup %1347  ;;  %647 = vst.msk [vmem:[#allocation3 + $0x8] sm:$0xff] %vm312_vm3, %v1346_v47  ;;  %v648_v49 = vadd.f32 %v1346_v47, %v1344_v46 }
 0x261   : > { %653 = vst.msk [vmem:[#allocation3 + $0x10] sm:$0xff] %vm312_vm3, %v1348_v48 }
 0x262   : > { %v654_v50 = vadd.f32 %v1348_v48, %v648_v49 }
 0x264   : > { %v1350_v51 = vpop.eup %1349 }
 0x265   : > { %659 = vst.msk [vmem:[#allocation3 + $0x18] sm:$0xff] %vm312_vm3, %v1350_v51  ;;  %v660_v52 = vadd.f32 %v1350_v51, %v654_v50 }
 0x266   : > { %v664_v54 = vld [vmem:[#allocation3] sm:$0xff] }
 0x267   : > { %1351 = vrcp.f32 %v660_v52  ;;  %v745_v55 = vld [vmem:[#allocation3 + $0x8] sm:$0xff] }
 0x268   : > { %v831_v60 = vld [vmem:[#allocation3 + $0x10] sm:$0xff] }
 0x26c   : > { %v917_v61 = vld [vmem:[#allocation3 + $0x18] sm:$0xff] }
 0x271   : > { %v1352_v53 = vpop.eup %1351 }
 0x272   : > { %v665_v56 = vmul.f32 %v1352_v53, %v664_v54  ;;  %v746_v57 = vmul.f32 %v1352_v53, %v745_v55  ;;  %v832_v62 = vmul.f32 %v1352_v53, %v831_v60  ;;  %v918_v63 = vmul.f32 %v1352_v53, %v917_v61 }
 0x274   : > { %1247 = vmatmul.mubr.msk.f32.vlgmr.msra.gmra.mrb[2].mxu0 %vm312_vm3, %v665_v56  ;;  %1252 = vmatmul.mubr.msk.f32.vlgmr.msra.gmra.mrb[8].mxu1 %vm312_vm3, %v746_v57 }
 0x275   : > { %1255 = vmatpush3.msra.mxu0 %v835_v58  ;;  %1260 = vmatpush3.msra.mxu1 %v921_v59 }
 0x276   : > { %1256 = vmatprep.mubr.msk.f32.mxu0 %vm1418_vm0, %v1419_v6  ;;  %1261 = vmatprep.mubr.msk.f32.mxu1 %vm1418_vm0, %v1419_v6 }
 0x277   : > { %1281 = vmatprep.subr.bf16.mxu0 %v1417_v3 }
 0x278   : > { %1257 = vmatmul.mubr.msk.f32.vlgmr.msra.gmra.mrb[4].mxu0 %vm312_vm3, %v832_v62  ;;  %1262 = vmatmul.mubr.msk.f32.vlgmr.msra.gmra.mrb[10].mxu1 %vm312_vm3, %v918_v63 }
 0x279   : > { %1272 = vmatprep.mubr.msk.f32.mxu0 %vm1418_vm0, %v1419_v6  ;;  %1283 = vmatpush3.bf16.msra.mxu0 %v1282_v2 }
 0x27a   : > { %1284 = vmatprep.subr.bf16.mxu0 %v1417_v3 }
 0x27d   : > { %1286 = vmatpush3.bf16.msra.mxu0 %v1285_v7 }
 0x347   : > { %v739_v6 = vpop.f32.mrb[2].mxu0  ;;  %v820_v8 = vpop.f32.mrb[8].mxu1 }
 0x348   : > { %743 = vst.msk [vmem:[#allocation4] sm:$0xff] %vm312_vm3, %v739_v6  ;;  %825 = vrot.lane.b32.xlu1 %v820_v8, %s1431_s7  ;;  %v1248_v9 = vpop.f32.mrb[3].mxu0  ;;  %v1253_v10 = vpop.f32.mrb[9].mxu1  ;;  %s1359_s7 = scalar_lea.vmem %s1358_s6, 256 }
 0x349   : > { %p1361_p1 = scmp.lt.s32.totalorder %s1359_s7, %s1353_s30 }
 0x34b   : > { %v906_v11 = vpop.f32.mrb[4].mxu0  ;;  %v992_v12 = vpop.f32.mrb[10].mxu1  ;;  %p1362_p2 = por %p1361_p1, %p1360_p0 }
 0x34c   : > { %997 = vrot.lane.b32.xlu1 %v992_v12, %s1432_s8  ;;  %v1263_v13 = vpop.f32.mrb[11].mxu1  ;;  %911 = vrot.lane.b32.xlu0 %v906_v11, %s1433_s9  ;;  %v1258_v14 = vpop.f32.mrb[5].mxu0 }
 0x34d   : > { %p1363_p3 = pnand %p1362_p2, %p1356_p13 }
 0x3ba   : > { %v826_v3 = vpop.permute.xlu1 %825 }
 0x3bb   : > { %829 = vst.msk [vmem:[#allocation4] sm:$0xff] %vm828_vm4, %v826_v3 }
 0x3be   : > { %v998_v15 = vpop.permute.xlu1 %997  ;;  %v912_v16 = vpop.permute.xlu0 %911 }
 0x3bf   : > { %915 = vst.msk [vmem:[#allocation4] sm:$0xff] %vm914_vm5, %v912_v16 }
 0x3c0   : > { %1001 = vst.msk [vmem:[#allocation4] sm:$0xff] %vm1000_vm6, %v998_v15 }
 0x3c7   : > { %v1002_v17 = vld [vmem:[#allocation4] sm:$0xff] }
 0x3c8   : > { %1273 = vmatmul.mubr.msk.f32.vlgmr.msra.gmra.mrb[6].mxu0 %vm232_vm1, %v1002_v17 }
 0x49b   : > { %v1083_v19 = vpop.f32.mrb[6].mxu0 }
 0x49c   : > { %v1084_v20 = vadd.f32 %v1181_v18, %v1083_v19  ;;  %v1274_v21 = vpop.f32.mrb[7].mxu0 }
 0x49e   : > { %1087 = vst.msk [vmem:[%s215_s15] sm:$0xff] %vm232_vm1, %v1084_v20 }
 0x49f   : > { %1366 = shalt.err (!%p1363_p3)
}
 0x4a0   : > { %s1367_s8 = scalar_lea.hbm %s1608_s25, 128  ;;  %s1371_s11 = scalar_lea.hbm %s1656_s5, 256 }
 0x4a1   : > { %p1368_p4 = scmp.ne.s32.totalorder %s1608_s25, %s1367_s8  ;;  %p1372_p9 = scmp.lt.u32.totalorder %s1608_s25, %s1656_s5 }
 0x4a2   : > { %p1373_p10 = scmp.lt.u32.totalorder %s1371_s11, %s1367_s8  ;;  %p1375_p12 = scmp.lt.u32.totalorder %s1367_s8, %s1608_s25 }
 0x4a3   : > { %p1369_p7 = pnand %p1368_p4, %p1503_p5 }
 0x4a4   : > { %p1374_p11 = por %p1373_p10, %p1372_p9 }
 0x4a5   : > { %p1370_p8 = pneg %p1369_p7 }
 0x4a6   : > { %p1376_p13 = por %p1375_p12, %p1374_p11 }
 0x4a8   : > { %p1377_p0 = pnand %p1376_p13, %p1370_p8 }
 0x4aa   : > { %1380 = shalt.err (!%p1377_p0)
}
 0x4ab   : > { %1287 = dma.vmem_to_hbm [thread:$0]  (%p1503_p5), %s1610_s16, 128, %s1608_s25, %s1089_s26  }
 0x4ac PF: > { %p1293_p1 = scmp.ge.s32.totalorder %s1415_s21, 2  ;;  %s1114_s14 = sand.u32 1, %s1403_s18  }
 0x4ad   : > { %s1115_s15 = scalar_lea.sflag [#allocation6], %s1114_s14 }
 0x4ae   : > { %p1290_p2 = pnand %p1293_p1, %p1507_p6 }
 0x4b0   : > { %1398 = dma.done.wait (!%p1290_p2), %s1115_s15, 128  }
 0x4b1   : > { %1400 = vsyncadd (!%p1290_p2), %s1115_s15, 4294967168  ;;  %p15_p3 = scmp.ge.s32.totalorder %s1490_s24, 4   ;;  %s1659_s18 = smov %s1407_s19 }
 0x4b2   : > { %s1660_s19 = smov %s1411_s20  ;;  %s1661_s20 = smov %s1501_s27 }
 0x4b3   : > { %s1662_s21 = smov %s1490_s24  ;;  %17 = sbr.rel (!%p15_p3) target bundleno = 3 (0x3), region = 78 }
 0x4ba   :  { %1120 = vsyncpa [#allocation6], 1 }
 0x4bb   :  { %1122 = vsyncpa [#allocation6 + $0x1], 1 }

// kernel: attention_forward.1
= control target key start
LH: loop header
LB: loop body
LE: loop exit
PB: predicated region body
PF: predicated region fallthrough
CT: control target
= control target key end

     0   :  { %10 = vsyncpa [#allocation6], 0  ;;  %s1651_s0 = inlined_call_operand.vmem [shape: f32[2,8,32], index: 0, kind: input, shape index: {}]   ;;  %s1652_s1 = inlined_call_operand.vmem [shape: f32[32,96], index: 1, kind: input, shape index: {}]   ;;  %s1653_s2 = inlined_call_operand.vmem [shape: f32[1,96], index: 2, kind: input, shape index: {}]   ;;  %s1654_s3 = inlined_call_operand.vmem [shape: f32[32,32], index: 3, kind: input, shape index: {}]   ;;  %s1655_s4 = inlined_call_operand.vmem [shape: f32[1,32], index: 4, kind: input, shape index: {}]   ;;  %s1656_s5 = inlined_call_operand.hbm [shape: f32[2,8,32], index: 5, kind: output, shape index: {}]  }
   0x1   :  { %12 = vsyncpa [#allocation6 + $0x1], 0  ;;  %s1465_s18 = smov 0   ;;  %s1467_s19 = smov 0  }
   0x2   :  { %s1469_s20 = smov 0   ;;  %s1471_s21 = smov 0  }
   0x3 LB: > { %s1486_s22 = sadd.s32 4294967295, %s1415_s21   ;;  %s1161_s23 = sadd.s32 4294967294, %s1415_s21   ;;  %s1415_s21 = sphi %s1471_s21, %s1662_s21   ;;  %s1411_s20 = sphi %s1469_s20, %s1661_s20   ;;  %s1407_s19 = sphi %s1467_s19, %s1660_s19   ;;  %s1403_s18 = sphi %s1465_s18, %s1659_s18  }
   0x4   : > { %s1490_s24 = sadd.s32 1, %s1415_s21   ;;  %s135_s25 = sadd.s32 1, %s1411_s20 }
   0x5   : > { %s132_s26 = ssub.s32 %s1415_s21, %s1490_s24  ;;  %p145_p0 = scmp.ne.s32.totalorder %s1411_s20, %s1407_s19 }
   0x6   : > { %p133_p1 = scmp.eq.s32.totalorder %s132_s26, 0  ;;  %p146_p2 = scmp.eq.s32.totalorder %s1486_s22, 1 }
   0x7   : > { %p151_p3 = scmp.ne.s32.totalorder %s1407_s19, %s1403_s18  ;;  %p152_p4 = scmp.eq.s32.totalorder %s1161_s23, 1 }
   0x8   : > { %s1501_s27 = scalar_select %p133_p1, %s1411_s20, %s135_s25  }
   0x9   : > { %p1503_p5 = por %p146_p2, %p145_p0  ;;  %p1507_p6 = por %p152_p4, %p151_p3 }
   0xa   : > { %p1164_p7 = scmp.ge.s32.totalorder %s1415_s21, 1  ;;  %p189_p8 = scmp.lt.s32.totalorder %s1415_s21, 3 }
   0xc   : > { %p190_p9 = pnand %p1164_p7, %p189_p8 }
   0xd   : > { %v221_v0 = vld [vmem:[%s1652_s1] sm:$0xff] (!%p190_p9)  ;;  %v222_v1 = vld [vmem:[%s1652_s1 + $0x8] sm:$0xff] (!%p190_p9)  ;;  %v223_v2 = vld [vmem:[%s1652_s1 + $0x10] sm:$0xff] (!%p190_p9)  ;;  %v1417_v3 = vmov (!%p190_p9), 0.0|0.0   ;;  %vm1418_vm0 = vmmov (!%p190_p9), 0   ;;  %v1419_v6 = vmov (!%p190_p9), 0.0  }
   0xe   : > { %193 = sbr.rel (%p190_p9) target bundleno = 1196 (0x4ac), region = 40  ;;  %1275 = vmatprep.subr.bf16.mxu0 (!%p190_p9), %v1417_v3  ;;  %v1276_v4 = vpack.c.bf16 (!%p190_p9), %v222_v1, %v221_v0  ;;  %v224_v5 = vld [vmem:[%s1652_s1 + $0x18] sm:$0xff] (!%p190_p9)  ;;  %1221 = vmatprep.mubr.msk.f32.mxu0 (!%p190_p9), %vm1418_vm0, %v1419_v6  ;;  %p216_p10 = scmp.lt.s32.totalorder (!%p190_p9), %s1486_s22, 1  ;;  %vm232_vm1 = vcmask (!%p190_p9), 261120   ;;  %v1167_v9 = vld [vmem:[%s1653_s2] ss:$0 sm:$0xff] (!%p190_p9) }
   0xf   : > { %1224 = vmatprep.subr.mxu1 (!%p190_p9), %v1419_v6  ;;  %1226 = vmatprep.mubr.msk.f32.mxu1 (!%p190_p9), %vm1418_vm0, %v1419_v6  ;;  %v1279_v7 = vpack.c.bf16 (!%p190_p9), %v224_v5, %v223_v2  ;;  %vm306_vm2 = vcmask (!%p190_p9), 785408   ;;  %s1420_s26 = smov (!%p190_p9), 120   ;;  %s1421_s30 = smov (!%p190_p9), 96   ;;  %vm312_vm3 = vcmask (!%p190_p9), 64512   ;;  %v1003_v0 = vld [vmem:[%s1654_s3] sm:$0xff] (!%p190_p9)  ;;  %v1004_v1 = vld [vmem:[%s1654_s3 + $0x8] sm:$0xff] (!%p190_p9) }
  0x10   : > { %1277 = vmatpush3.bf16.msra.mxu0 (!%p190_p9), %v1276_v4  ;;  %s1422_s6 = smov (!%p190_p9), 80   ;;  %s1423_s7 = smov (!%p190_p9), 88   ;;  %v1282_v2 = vpack.c.bf16 (!%p190_p9), %v1004_v1, %v1003_v0  ;;  %v1005_v4 = vld [vmem:[%s1654_s3 + $0x10] sm:$0xff] (!%p190_p9)  ;;  %v1006_v5 = vld [vmem:[%s1654_s3 + $0x18] sm:$0xff] (!%p190_p9)  ;;  %vm828_vm4 = vcmask (!%p190_p9), 130112   ;;  %vm914_vm5 = vcmask (!%p190_p9), 195712  }
  0x11   : > { %1278 = vmatprep.subr.bf16.mxu0 (!%p190_p9), %v1417_v3  ;;  %s1424_s8 = smov (!%p190_p9), 72   ;;  %s1425_s9 = smov (!%p190_p9), 112   ;;  %vm1000_vm6 = vcmask (!%p190_p9), 261312  }
  0x12   : > { %s1426_s10 = smov (!%p190_p9), 64   ;;  %s1427_s11 = smov (!%p190_p9), 104  }
  0x13   : > { %s1428_s12 = smov (!%p190_p9), 48  }
  0x14   : > { %1280 = vmatpush3.bf16.msra.mxu0 (!%p190_p9), %v1279_v7  ;;  %v1285_v7 = vpack.c.bf16 (!%p190_p9), %v1006_v5, %v1005_v4 }
  0x15   : > { %s217_s13 = scalar_select %p216_p10, %s1486_s22, 1  ;;  %1244 = vmatprep.subr.mxu0 %v1419_v6 }
  0x17   : > { %s1166_s14 = sshll.u32 %s217_s13, 3  ;;  %s1429_s13 = smov 56  }
  0x18   : > { %s219_s17 = scalar_lea.vmem %s1651_s0, %s1166_s14  ;;  %s1430_s14 = smov 40  }
  0x19   : > { %v220_v8 = vld [vmem:[%s219_s17] sm:$0xff] }
  0x1a   : > { %1222 = vmatmul.mubr.msk.f32.vlgmr.msra.gmra.mrb[0].mxu0 %vm232_vm1, %v220_v8 }
  0x1b   : > { %1246 = vmatprep.mubr.msk.f32.mxu0 %vm1418_vm0, %v1419_v6 }
  0xed   : > { %v302_v10 = vpop.f32.mrb[0].mxu0 }
  0xee   : > { %v303_v11 = vadd.f32 %v1167_v9, %v302_v10  ;;  %v1223_v12 = vpop.f32.mrb[1].mxu0 }
  0xf0   : > { %307 = vst.msk [vmem:[#allocation2] sm:$0xff] %vm306_vm2, %v303_v11 }
  0xf7   : > { %v388_v13 = vld [vmem:[#allocation2] sm:$0xff] }
  0xf8   : > { %390 = vrot.lane.b32.xlu1 %v388_v13, %s1420_s26  ;;  %310 = vrot.lane.b32.xlu0 %v388_v13, %s1421_s30 }
  0xfc   : > { %475 = vrot.lane.b32.xlu1 %v388_v13, %s1422_s6  ;;  %392 = vrot.lane.b32.xlu0 %v388_v13, %s1423_s7  ;;  %s1431_s7 = smov 8  }
 0x100   : > { %558 = vrot.lane.b32.xlu1 %v388_v13, %s1424_s8  ;;  %473 = vrot.lane.b32.xlu0 %v388_v13, %s1425_s9  ;;  %s1432_s8 = smov 24   ;;  %s1433_s9 = smov 16  }
 0x104   : > { %667 = vrot.lane.b32.xlu1 %v388_v13, %s1426_s10  ;;  %556 = vrot.lane.b32.xlu0 %v388_v13, %s1427_s11  ;;  %s213_s10 = sand.u32 1, %s1407_s19  }
 0x105   : > { %s1165_s11 = sshll.u32 %s213_s10, 3  ;;  %s1089_s26 = scalar_lea.sflag [#allocation6], %s213_s10 }
 0x106   : > { %s215_s15 = scalar_lea.vmem [#allocation5], %s1165_s11 }
 0x107   : > { %s1102_s16 = sshll.u32 %s215_s15, 4  ;;  %s1610_s16 = int_to_ptr.vmem [resolvable:$true] %s1102_s16 }
 0x108   : > { %834 = vrot.lane.b32.xlu1 %v388_v13, %s1428_s12  ;;  %748 = vrot.lane.b32.xlu0 %v388_v13, %s1429_s13  ;;  %s1353_s30 = scalar_lea.vmem %s1610_s16, 128 }
 0x109   : > { %p1354_p11 = scmp.ne.s32.totalorder %s1610_s16, %s1353_s30 }
 0x10b   : > { %p1355_p12 = pnand %p1354_p11, %p1503_p5 }
 0x10c   : > { %920 = vrot.lane.b32.xlu0 %v388_v13, %s1430_s14  ;;  %s1184_s14 = sshll.u32 %s1486_s22, 7  ;;  %s1434_s22 = smov [#allocation5]  }
 0x10d   : > { %s1608_s25 = scalar_lea.hbm %s1656_s5, %s1184_s14  ;;  %p1356_p13 = pneg %p1355_p12 }
 0x10e   : > { %s1357_s6 = sshll.u32 %s1434_s22, 4  ;;  %s1358_s6 = int_to_ptr.vmem [resolvable:$false] %s1357_s6 }
 0x10f   : > { %p1360_p0 = scmp.lt.s32.totalorder %s1610_s16, %s1358_s6 }
 0x16a   : > { %v391_v14 = vpop.permute.xlu1 %390  ;;  %v311_v15 = vpop.permute.xlu0 %310 }
 0x16b   : > { %1225 = vmatpush3.xpose.msk.msra.mxu1 %vm312_vm3, %v311_v15 }
 0x16c   : > { %1229 = vmatprep.subr.mxu1 %v1419_v6 }
 0x16e   : > { %v476_v16 = vpop.permute.xlu1 %475  ;;  %1227 = vmatmul.mubr.msk.f32.vlgmr.msra.gmra.mrb[0].mxu1 %vm312_vm3, %v388_v13  ;;  %v393_v17 = vpop.permute.xlu0 %392 }
 0x16f   : > { %1230 = vmatpush3.xpose.msk.msra.mxu1 %vm312_vm3, %v393_v17  ;;  %1231 = vmatprep.mubr.msk.f32.mxu1 %vm1418_vm0, %v1419_v6 }
 0x170   : > { %1234 = vmatprep.subr.mxu1 %v1419_v6 }
 0x172   : > { %v559_v18 = vpop.permute.xlu1 %558  ;;  %1232 = vmatmul.mubr.msk.f32.vlgmr.msra.gmra.mrb[2].mxu1 %vm312_vm3, %v391_v14  ;;  %v474_v19 = vpop.permute.xlu0 %473 }
 0x173   : > { %1235 = vmatpush3.xpose.msk.msra.mxu1 %vm312_vm3, %v476_v16  ;;  %1236 = vmatprep.mubr.msk.f32.mxu1 %vm1418_vm0, %v1419_v6 }
 0x174   : > { %1239 = vmatprep.subr.mxu1 %v1419_v6 }
 0x176   : > { %v668_v20 = vpop.permute.xlu1 %667  ;;  %1237 = vmatmul.mubr.msk.f32.vlgmr.msra.gmra.mrb[4].mxu1 %vm312_vm3, %v474_v19  ;;  %v557_v21 = vpop.permute.xlu0 %556 }
 0x177   : > { %1240 = vmatpush3.xpose.msk.msra.mxu1 %vm312_vm3, %v559_v18  ;;  %1245 = vmatpush3.msra.mxu0 %v668_v20  ;;  %v1181_v18 = vld [vmem:[%s1655_s4] ss:$0 sm:$0xff] }
 0x178   : > { %1241 = vmatprep.mubr.msk.f32.mxu1 %vm1418_vm0, %v1419_v6  ;;  %1249 = vmatprep.subr.mxu1 %v1419_v6 }
 0x179   : > { %1254 = vmatprep.subr.mxu0 %v1419_v6 }
 0x17a   : > { %1242 = vmatmul.mubr.msk.f32.vlgmr.msra.gmra.mrb[6].mxu1 %vm312_vm3, %v557_v21  ;;  %v749_v22 = vpop.permute.xlu0 %748  ;;  %v835_v58 = vpop.permute.xlu1 %834 }
 0x17b   : > { %1250 = vmatpush3.msra.mxu1 %v749_v22  ;;  %1251 = vmatprep.mubr.msk.f32.mxu1 %vm1418_vm0, %v1419_v6 }
 0x17c   : > { %1259 = vmatprep.subr.mxu1 %v1419_v6 }
 0x17e   : > { %v921_v59 = vpop.permute.xlu0 %920 }
 0x241   : > { %v383_v23 = vpop.f32.mrb[0].mxu1 }
 0x242   : > { %387 = vst.msk [vmem:[#allocation3] sm:$0xff] %vm312_vm3, %v383_v23  ;;  %v1228_v24 = vpop.f32.mrb[1].mxu1 }
 0x245   : > { %v464_v25 = vpop.f32.mrb[2].mxu1 }
 0x246   : > { %469 = vst.msk [vmem:[#allocation3 + $0x8] sm:$0xff] %vm312_vm3, %v464_v25  ;;  %v470_v26 = vmax.f32 %v383_v23, %v464_v25  ;;  %v1233_v27 = vpop.f32.mrb[3].mxu1 }
 0x249   : > { %v547_v28 = vpop.f32.mrb[4].mxu1  ;;  %v637_v34 = vld [vmem:[#allocation3] sm:$0xff] }
 0x24a   : > { %552 = vst.msk [vmem:[#allocation3 + $0x10] sm:$0xff] %vm312_vm3, %v547_v28  ;;  %v553_v29 = vmax.f32 %v470_v26, %v547_v28  ;;  %v1238_v30 = vpop.f32.mrb[5].mxu1 }
 0x24d   : > { %v630_v31 = vpop.f32.mrb[6].mxu1  ;;  %v643_v35 = vld [vmem:[#allocation3 + $0x8] sm:$0xff] }
 0x24e   : > { %635 = vst.msk [vmem:[#allocation3 + $0x18] sm:$0xff] %vm312_vm3, %v630_v31  ;;  %v636_v32 = vmax.f32 %v553_v29, %v630_v31  ;;  %v1243_v33 = vpop.f32.mrb[7].mxu1 }
 0x250   : > { %v638_v36 = vsub.f32 %v637_v34, %v636_v32  ;;  %v644_v37 = vsub.f32 %v643_v35, %v636_v32 }
 0x251   : > { %v649_v38 = vld [vmem:[#allocation3 + $0x10] sm:$0xff] }
 0x252   : > { %v639_v39 = vmul.f32 1.442695, %v638_v36  ;;  %v645_v40 = vmul.f32 1.442695, %v644_v37  ;;  %v650_v41 = vsub.f32 %v649_v38, %v636_v32 }
 0x254   : > { %1343 = vpow2.f32 %v639_v39  ;;  %v651_v42 = vmul.f32 1.442695, %v650_v41 }
 0x255   : > { %1345 = vpow2.f32 %v645_v40  ;;  %v655_v43 = vld [vmem:[#allocation3 + $0x18] sm:$0xff] }
 0x256   : > { %1347 = vpow2.f32 %v651_v42  ;;  %v656_v44 = vsub.f32 %v655_v43, %v636_v32 }
 0x258   : > { %v657_v45 = vmul.f32 1.442695, %v656_v44 }
 0x25a   : > { %1349 = vpow2.f32 %v657_v45 }
 0x25e   : > { %v1344_v46 = vpop.eup %1343 }
 0x25f   : > { %v1346_v47 = vpop.eup %1345  ;;  %641 = vst.msk [vmem:[#allocation3] sm:$0xff] %vm312_vm3, %v1344_v46 }
 0x260   : > { %v1348_v48 = vpop.eup %1347  ;;  %647 = vst.msk [vmem:[#allocation3 + $0x8] sm:$0xff] %vm312_vm3, %v1346_v47  ;;  %v648_v49 = vadd.f32 %v1346_v47, %v1344_v46 }
 0x261   : > { %653 = vst.msk [vmem:[#allocation3 + $0x10] sm:$0xff] %vm312_vm3, %v1348_v48 }
 0x262   : > { %v654_v50 = vadd.f32 %v1348_v48, %v648_v49 }
 0x264   : > { %v1350_v51 = vpop.eup %1349 }
 0x265   : > { %659 = vst.msk [vmem:[#allocation3 + $0x18] sm:$0xff] %vm312_vm3, %v1350_v51  ;;  %v660_v52 = vadd.f32 %v1350_v51, %v654_v50 }
 0x266   : > { %v664_v54 = vld [vmem:[#allocation3] sm:$0xff] }
 0x267   : > { %1351 = vrcp.f32 %v660_v52  ;;  %v745_v55 = vld [vmem:[#allocation3 + $0x8] sm:$0xff] }
 0x268   : > { %v831_v60 = vld [vmem:[#allocation3 + $0x10] sm:$0xff] }
 0x26c   : > { %v917_v61 = vld [vmem:[#allocation3 + $0x18] sm:$0xff] }
 0x271   : > { %v1352_v53 = vpop.eup %1351 }
 0x272   : > { %v665_v56 = vmul.f32 %v1352_v53, %v664_v54  ;;  %v746_v57 = vmul.f32 %v1352_v53, %v745_v55  ;;  %v832_v62 = vmul.f32 %v1352_v53, %v831_v60  ;;  %v918_v63 = vmul.f32 %v1352_v53, %v917_v61 }
 0x274   : > { %1247 = vmatmul.mubr.msk.f32.vlgmr.msra.gmra.mrb[2].mxu0 %vm312_vm3, %v665_v56  ;;  %1252 = vmatmul.mubr.msk.f32.vlgmr.msra.gmra.mrb[8].mxu1 %vm312_vm3, %v746_v57 }
 0x275   : > { %1255 = vmatpush3.msra.mxu0 %v835_v58  ;;  %1260 = vmatpush3.msra.mxu1 %v921_v59 }
 0x276   : > { %1256 = vmatprep.mubr.msk.f32.mxu0 %vm1418_vm0, %v1419_v6  ;;  %1261 = vmatprep.mubr.msk.f32.mxu1 %vm1418_vm0, %v1419_v6 }
 0x277   : > { %1281 = vmatprep.subr.bf16.mxu0 %v1417_v3 }
 0x278   : > { %1257 = vmatmul.mubr.msk.f32.vlgmr.msra.gmra.mrb[4].mxu0 %vm312_vm3, %v832_v62  ;;  %1262 = vmatmul.mubr.msk.f32.vlgmr.msra.gmra.mrb[10].mxu1 %vm312_vm3, %v918_v63 }
 0x279   : > { %1272 = vmatprep.mubr.msk.f32.mxu0 %vm1418_vm0, %v1419_v6  ;;  %1283 = vmatpush3.bf16.msra.mxu0 %v1282_v2 }
 0x27a   : > { %1284 = vmatprep.subr.bf16.mxu0 %v1417_v3 }
 0x27d   : > { %1286 = vmatpush3.bf16.msra.mxu0 %v1285_v7 }
 0x347   : > { %v739_v6 = vpop.f32.mrb[2].mxu0  ;;  %v820_v8 = vpop.f32.mrb[8].mxu1 }
 0x348   : > { %743 = vst.msk [vmem:[#allocation4] sm:$0xff] %vm312_vm3, %v739_v6  ;;  %825 = vrot.lane.b32.xlu1 %v820_v8, %s1431_s7  ;;  %v1248_v9 = vpop.f32.mrb[3].mxu0  ;;  %v1253_v10 = vpop.f32.mrb[9].mxu1  ;;  %s1359_s7 = scalar_lea.vmem %s1358_s6, 256 }
 0x349   : > { %p1361_p1 = scmp.lt.s32.totalorder %s1359_s7, %s1353_s30 }
 0x34b   : > { %v906_v11 = vpop.f32.mrb[4].mxu0  ;;  %v992_v12 = vpop.f32.mrb[10].mxu1  ;;  %p1362_p2 = por %p1361_p1, %p1360_p0 }
 0x34c   : > { %997 = vrot.lane.b32.xlu1 %v992_v12, %s1432_s8  ;;  %v1263_v13 = vpop.f32.mrb[11].mxu1  ;;  %911 = vrot.lane.b32.xlu0 %v906_v11, %s1433_s9  ;;  %v1258_v14 = vpop.f32.mrb[5].mxu0 }
 0x34d   : > { %p1363_p3 = pnand %p1362_p2, %p1356_p13 }
 0x3ba   : > { %v826_v3 = vpop.permute.xlu1 %825 }
 0x3bb   : > { %829 = vst.msk [vmem:[#allocation4] sm:$0xff] %vm828_vm4, %v826_v3 }
 0x3be   : > { %v998_v15 = vpop.permute.xlu1 %997  ;;  %v912_v16 = vpop.permute.xlu0 %911 }
 0x3bf   : > { %915 = vst.msk [vmem:[#allocation4] sm:$0xff] %vm914_vm5, %v912_v16 }
 0x3c0   : > { %1001 = vst.msk [vmem:[#allocation4] sm:$0xff] %vm1000_vm6, %v998_v15 }
 0x3c7   : > { %v1002_v17 = vld [vmem:[#allocation4] sm:$0xff] }
 0x3c8   : > { %1273 = vmatmul.mubr.msk.f32.vlgmr.msra.gmra.mrb[6].mxu0 %vm232_vm1, %v1002_v17 }
 0x49b   : > { %v1083_v19 = vpop.f32.mrb[6].mxu0 }
 0x49c   : > { %v1084_v20 = vadd.f32 %v1181_v18, %v1083_v19  ;;  %v1274_v21 = vpop.f32.mrb[7].mxu0 }
 0x49e   : > { %1087 = vst.msk [vmem:[%s215_s15] sm:$0xff] %vm232_vm1, %v1084_v20 }
 0x49f   : > { %1366 = shalt.err (!%p1363_p3)
}
 0x4a0   : > { %s1367_s8 = scalar_lea.hbm %s1608_s25, 128  ;;  %s1371_s11 = scalar_lea.hbm %s1656_s5, 256 }
 0x4a1   : > { %p1368_p4 = scmp.ne.s32.totalorder %s1608_s25, %s1367_s8  ;;  %p1372_p9 = scmp.lt.u32.totalorder %s1608_s25, %s1656_s5 }
 0x4a2   : > { %p1373_p10 = scmp.lt.u32.totalorder %s1371_s11, %s1367_s8  ;;  %p1375_p12 = scmp.lt.u32.totalorder %s1367_s8, %s1608_s25 }
 0x4a3   : > { %p1369_p7 = pnand %p1368_p4, %p1503_p5 }
 0x4a4   : > { %p1374_p11 = por %p1373_p10, %p1372_p9 }
 0x4a5   : > { %p1370_p8 = pneg %p1369_p7 }
 0x4a6   : > { %p1376_p13 = por %p1375_p12, %p1374_p11 }
 0x4a8   : > { %p1377_p0 = pnand %p1376_p13, %p1370_p8 }
 0x4aa   : > { %1380 = shalt.err (!%p1377_p0)
}
 0x4ab   : > { %1287 = dma.vmem_to_hbm [thread:$0]  (%p1503_p5), %s1610_s16, 128, %s1608_s25, %s1089_s26  }
 0x4ac PF: > { %p1293_p1 = scmp.ge.s32.totalorder %s1415_s21, 2  ;;  %s1114_s14 = sand.u32 1, %s1403_s18  }
 0x4ad   : > { %s1115_s15 = scalar_lea.sflag [#allocation6], %s1114_s14 }
 0x4ae   : > { %p1290_p2 = pnand %p1293_p1, %p1507_p6 }
 0x4b0   : > { %1398 = dma.done.wait (!%p1290_p2), %s1115_s15, 128  }
 0x4b1   : > { %1400 = vsyncadd (!%p1290_p2), %s1115_s15, 4294967168  ;;  %p15_p3 = scmp.ge.s32.totalorder %s1490_s24, 4   ;;  %s1659_s18 = smov %s1407_s19 }
 0x4b2   : > { %s1660_s19 = smov %s1411_s20  ;;  %s1661_s20 = smov %s1501_s27 }
 0x4b3   : > { %s1662_s21 = smov %s1490_s24  ;;  %17 = sbr.rel (!%p15_p3) target bundleno = 3 (0x3), region = 78 }
 0x4ba   :  { %1120 = vsyncpa [#allocation6], 1 }
 0x4bb   :  { %1122 = vsyncpa [#allocation6 + $0x1], 1 }

</bundles_post_ra>
